<compile_context>
chip_gen: v7x
topology: tpu7x:2x2x1
jax: 0.10.0
libtpu: 0.0.40
codegen_flags: <defaults>
</compile_context>

<pallas_src>
import functools

import numpy as np
import jax
import jax.numpy as jnp
from jax.experimental import pallas as pl
from jax.experimental.pallas import tpu as pltpu

_LANE = 128


def _act(x):
    return jax.nn.gelu(x, approximate=True)


def _sublane(dtype):
    """Minimum second-minor block multiple for a dtype (8 f32, 16 bf16, 32 i8)."""
    return max(8, 32 // jnp.dtype(dtype).itemsize)


def _vmem_capacity_bytes():
    """Physical VMEM per TensorCore; conservative 64 MiB (v7x) if unqueryable."""
    try:
        info = pltpu.get_tpu_info()
        cap = int(getattr(info, "vmem_capacity_bytes", 0) or 0)
        if cap > 0:
            return cap
    except Exception:
        pass
    return 64 * 2**20


def mixer_link_kernel(x_ref, w1t_ref, b1_ref, w2_ref, b2_ref, w3_ref, b3_ref,
                      w4t_ref, b4_ref, o_ref, acc_ref, *, compute_dtype):
    """One grid step = `bt` batch elements x one Dm chunk.

    Grid: (B // bt, Dm // tdm); axis 1 ("arbitrary") accumulates into acc_ref.

      x_ref  : (bt*N, Dp)      bf16 tokens, feature-padded to Dp
      w1t_ref: (Dp, tdm)       to_cols_expand.weight.T chunk (padded rows zero)
      b1_ref : (1, tdm)        f32
      w2_ref : (bt*Nm, bt*N)   block-diag to_rows_expand.weight (LHS operand)
      b2_ref : (bt*Nm, 1)      f32
      w3_ref : (bt*R, bt*Nm)   block-diag to_rows_contract.weight (LHS operand)
      b3_ref : (bt*R, 1)       f32
      w4t_ref: (tdm, Dp)       to_cols_contract.weight.T chunk (padded cols zero)
      b4_ref : (1, Dp)         f32 (padded cols zero)
      o_ref  : (bt*R, Dp)
      acc_ref: (bt*R, Dp) f32  VMEM accumulator over Dm chunks
    """
    f32 = jnp.float32
    dm = pl.program_id(1)

    @pl.when(dm == 0)
    def _():
        acc_ref[...] = jnp.zeros_like(acc_ref)

    # Feature expansion over all bt*N token rows: (bt*N, Dp) @ (Dp, tdm).
    a1 = _act(jnp.dot(x_ref[...], w1t_ref[...], preferred_element_type=f32)
              + b1_ref[...]).astype(compute_dtype)                      # (bt*N, tdm)

    # Token mixing: one block-diagonal matmul per layer over all bt batch
    # elements.  Weights on the LHS -> standard (M,K)x(K,N) MXU matmuls, no
    # transposes, and larger contraction K than per-batch dots.
    a2 = _act(jnp.dot(w2_ref[...], a1, preferred_element_type=f32)
              + b2_ref[...]).astype(compute_dtype)                      # (bt*Nm, tdm)
    a3 = _act(jnp.dot(w3_ref[...], a2, preferred_element_type=f32)
              + b3_ref[...]).astype(compute_dtype)                      # (bt*R, tdm)

    # Feature contraction, accumulated across Dm chunks in f32.
    acc_ref[...] += jnp.dot(a3, w4t_ref[...], preferred_element_type=f32)

    @pl.when(dm == pl.num_programs(1) - 1)
    def _():
        y = acc_ref[...] + b4_ref[...]
        o_ref[...] = _act(y).astype(o_ref.dtype)      # MixerLink's outer activation


def _pick_batch_tile(batch, n_in, n_out, *, in_sub, out_sub, target_rows,
                     prefer_multi_step):
    """Fold batch elements per grid step.  Keep blocks sublane-aligned (unless
    they span the full array); on small-VMEM / dual-TC parts keep >=2 grid steps
    so both TensorCores get work; otherwise take the biggest tile <= target."""
    candidates = []
    for bt in range(1, batch + 1):
        if batch % bt:
            continue
        ok_in = (bt == batch) or ((bt * n_in) % in_sub == 0)
        ok_out = (bt == batch) or ((bt * n_out) % out_sub == 0)
        if ok_in and ok_out:
            candidates.append(bt)
    if not candidates:
        return batch
    target = max(1, target_rows // max(n_in, 1))
    best = None
    for bt in candidates:                                    # ascending
        steps_ok = (not prefer_multi_step) or batch < 2 or (batch // bt) >= 2
        if bt <= target and steps_ok:
            best = bt
    if best is None:
        fits = [bt for bt in candidates if bt <= target]
        best = fits[-1] if fits else candidates[0]
    return best


def _estimate_vmem_bytes(bt, n_in, n_mid, n_out, dp, tdm, cd_bytes, out_bytes,
                         double_buffer_weights=True):
    """Rough peak-VMEM model for one grid step (blocks + scratch + temporaries)."""
    wmul = 2 if double_buffer_weights else 1
    io = 2 * bt * n_in * dp * cd_bytes + 2 * bt * n_out * dp * out_bytes
    dm_chunks = 2 * (2 * dp * tdm * cd_bytes + tdm * 4)       # w1t/w4t chunks + b1
    fixed = wmul * ((bt * n_mid * bt * n_in + bt * n_out * bt * n_mid) * cd_bytes
                    + (bt * n_mid + bt * n_out + dp) * 4)
    acc = bt * n_out * dp * 4
    temps = (bt * n_in + 2 * bt * n_mid + 2 * bt * n_out) * tdm * 6
    return io + dm_chunks + fixed + acc + temps


def _pick_dm_tile(dm, vmem_needed, budget, max_dm_tile=None):
    """Chunk size along the expanded-feature dim: a multiple of 128 dividing Dm
    (or full Dm).  Largest chunk that fits the VMEM budget."""
    if dm % _LANE != 0:
        return dm                                   # only a full-extent block is legal
    cands = [t for t in range(_LANE, dm + 1, _LANE) if dm % t == 0]
    if max_dm_tile is not None:
        cands = [t for t in cands if t <= max_dm_tile] or cands[:1]
    for t in sorted(cands, reverse=True):
        if vmem_needed(t) <= budget:
            return t
    return min(cands)


def init_mixer_link_params(key, in_rows, out_rows, features, multiplier=4,
                           dtype=jnp.float32):
    """PyTorch nn.Linear default init: U(-1/sqrt(fan_in), 1/sqrt(fan_in))."""
    def linear(k, fan_in, fan_out):
        kw, kb = jax.random.split(k)
        bound = 1.0 / np.sqrt(fan_in)
        w = jax.random.uniform(kw, (fan_out, fan_in), dtype, -bound, bound)
        b = jax.random.uniform(kb, (1, fan_out), dtype, -bound, bound)
        return w, b

    k1, k2, k3, k4 = jax.random.split(key, 4)
    w1, b1 = linear(k1, features, features * multiplier)          # to_cols_expand
    w2, b2 = linear(k2, in_rows, in_rows * multiplier)            # to_rows_expand
    w3, b3 = linear(k3, in_rows * multiplier, out_rows)           # to_rows_contract
    w4, b4 = linear(k4, features * multiplier, features)          # to_cols_contract
    return dict(w1=w1, b1=b1, w2=w2, b2=b2, w3=w3, b3=b3, w4=w4, b4=b4)


def mixer_link(xs, params, out_tokens, *, compute_dtype=jnp.bfloat16,
               max_dm_tile=None):
    """xs: tuple of (B, n_i, D) arrays; returns tuple of (B, o_j, D) arrays."""
    x = jnp.concatenate(xs, axis=1)                     # join(xs) along tokens
    B, N, D = x.shape
    out_dtype = x.dtype

    w1, b1 = params["w1"], params["b1"]                 # (Dm, D), (1, Dm)
    w2, b2 = params["w2"], params["b2"]                 # (Nm, N), (1, Nm)
    w3, b3 = params["w3"], params["b3"]                 # (R, Nm), (1, R)
    w4, b4 = params["w4"], params["b4"]                 # (D, Dm), (1, D)
    Dm, Nm, R = w1.shape[0], w2.shape[0], w3.shape[0]

    Dp = pl.cdiv(D, _LANE) * _LANE
    pad = Dp - D
    f32 = jnp.float32
    cd_bytes = jnp.dtype(compute_dtype).itemsize
    out_bytes = jnp.dtype(out_dtype).itemsize

    # Generation-aware sizing: v7x has 64 MiB VMEM/TC + 2 TCs (prefer >=2 parallel
    # grid steps, smaller tiles); v5e/v6e have 128 MiB + 1 TC (bigger tiles OK).
    cap = _vmem_capacity_bytes()
    is_small_vmem = cap <= 64 * 2**20
    budget = int(0.70 * cap)

    bt = _pick_batch_tile(
        B, N, R,
        in_sub=_sublane(compute_dtype), out_sub=_sublane(out_dtype),
        target_rows=(256 if is_small_vmem else 512),
        prefer_multi_step=is_small_vmem)

    def vmem_needed(tdm_):
        return _estimate_vmem_bytes(bt, N, Nm, R, Dp, tdm_, cd_bytes, out_bytes,
                                    double_buffer_weights=True)

    tdm = _pick_dm_tile(Dm, vmem_needed, budget, max_dm_tile)
    n_dm = Dm // tdm
    grid = (B // bt, n_dm)

    # One-time layout plumbing outside the kernel: pre-transpose / pre-orient the
    # weights, build the block-diagonal token-mixing weights, and pad the feature
    # dim to a lane-dense multiple of 128 (zero padding => padded output features
    # are exactly GELU(0) = 0 and are sliced off below).
    w1t = jnp.pad(w1.T, ((0, pad), (0, 0))).astype(compute_dtype)         # (Dp, Dm)
    w4t = jnp.pad(w4.T, ((0, 0), (0, pad))).astype(compute_dtype)         # (Dm, Dp)
    eye = jnp.eye(bt, dtype=f32)
    w2bd = jnp.kron(eye, w2.astype(f32)).astype(compute_dtype)            # (bt*Nm, bt*N)
    w3bd = jnp.kron(eye, w3.astype(f32)).astype(compute_dtype)            # (bt*R, bt*Nm)
    b1r = b1.reshape(1, Dm).astype(f32)
    b2bd = jnp.tile(b2.reshape(Nm, 1).astype(f32), (bt, 1))               # (bt*Nm, 1)
    b3bd = jnp.tile(b3.reshape(R, 1).astype(f32), (bt, 1))                # (bt*R, 1)
    b4r = jnp.pad(b4.reshape(1, D), ((0, 0), (0, pad))).astype(f32)       # (1, Dp)

    # Cast the input to the MXU operand dtype here: halves HBM traffic and the
    # double-buffered input block; no extra precision loss vs. in-kernel cast.
    xp = jnp.pad(x, ((0, 0), (0, 0), (0, pad))).astype(compute_dtype)
    xp = xp.reshape(B * N, Dp)

    flops = 2 * B * (N * Dp * Dm + Nm * N * Dm + R * Nm * Dm + R * Dm * Dp)
    transcendentals = B * (N * Dm + Nm * Dm + R * Dm + R * Dp)
    bytes_accessed = int(
        xp.size * cd_bytes + B * R * Dp * out_bytes
        + (w1t.size + w2bd.size + w3bd.size + w4t.size) * cd_bytes
        + (b1r.size + b2bd.size + b3bd.size + b4r.size) * 4)

    # Clamp the scoped-VMEM request below physical capacity (v7x: 64 MiB/TC).
    working = vmem_needed(tdm)
    vmem_limit = int(min(int(0.875 * cap), max(32 * 2**20, 2 * working)))

    kernel = functools.partial(mixer_link_kernel, compute_dtype=compute_dtype)
    args = (xp, w1t, b1r, w2bd, b2bd, w3bd, b3bd, w4t, b4r)

    def build(single_buffer_invariants):
        inv_kwargs = (dict(pipeline_mode=pl.Buffered(1))
                      if single_buffer_invariants else {})

        def inv(a):  # grid-invariant operand: constant index_map, no re-DMA needed
            return pl.BlockSpec(a.shape, lambda i, j: (0, 0), **inv_kwargs)

        return pl.pallas_call(
            kernel,
            out_shape=jax.ShapeDtypeStruct((B * R, Dp), out_dtype),
            grid_spec=pltpu.PrefetchScalarGridSpec(
                num_scalar_prefetch=0,
                grid=grid,
                in_specs=[
                    pl.BlockSpec((bt * N, Dp), lambda i, j: (i, 0)),
                    pl.BlockSpec((Dp, tdm), lambda i, j: (0, j)),
                    pl.BlockSpec((1, tdm), lambda i, j: (0, j)),
                    inv(w2bd), inv(b2bd), inv(w3bd), inv(b3bd),
                    pl.BlockSpec((tdm, Dp), lambda i, j: (j, 0)),
                    inv(b4r),
                ],
                out_specs=pl.BlockSpec((bt * R, Dp), lambda i, j: (i, 0)),
                scratch_shapes=[pltpu.VMEM((bt * R, Dp), jnp.float32)],
            ),
            compiler_params=pltpu.CompilerParams(
                dimension_semantics=("parallel", "arbitrary"),
                vmem_limit_bytes=vmem_limit),
            cost_estimate=pl.CostEstimate(
                flops=flops, transcendentals=transcendentals,
                bytes_accessed=bytes_accessed),
        )

    try:
        # Grid-invariant weights/biases single-buffered: halves their fixed
        # VMEM residency (index_map is constant, so no re-DMA is needed).
        out = jax.block_until_ready(build(True)(*args))
    except Exception:
        # TODO(synk): drop this fallback once pipeline_mode=pl.Buffered(1) is
        # confirmed supported on all deployed jax/Mosaic versions.
        out = jax.block_until_ready(build(False)(*args))

    y = out.reshape(B, R, Dp)[:, :, :D]
    split_points = list(np.cumsum(out_tokens)[:-1])     # fork(y, splits=out_tokens)
    return tuple(jnp.split(y, split_points, axis=1))


def mixer_link_reference(xs, params, out_tokens):
    """Pure-JAX f32 reference mirroring the PyTorch module exactly."""
    x = jnp.concatenate(xs, axis=1).astype(jnp.float32)
    w1, b1 = params["w1"], params["b1"]
    w2, b2 = params["w2"], params["b2"]
    w3, b3 = params["w3"], params["b3"]
    w4, b4 = params["w4"], params["b4"]
    h = jnp.einsum('bnd,ed->bne', x, w1) + b1          # to_cols_expand
    h = _act(jnp.swapaxes(h, 1, 2))                    # 'b n d -> b d n' + act
    h = _act(jnp.einsum('bdn,mn->bdm', h, w2) + b2)    # to_rows_expand + act
    h = jnp.einsum('bdm,rm->bdr', h, w3) + b3          # to_rows_contract
    h = _act(jnp.swapaxes(h, 1, 2))                    # 'b d n -> b n d' + act
    y = _act(jnp.einsum('bre,de->brd', h, w4) + b4)    # to_cols_contract + outer act
    split_points = list(np.cumsum(out_tokens)[:-1])
    return tuple(jnp.split(y, split_points, axis=1))


if __name__ == "__main__":
    key = jax.random.PRNGKey(0)

    # Case 1: small shapes, single Dm chunk, batch-folded block-diag token mixing.
    #   in_tokens = (4, 4) -> in_rows = 8 ; out_tokens = (3, 5) -> out_rows = 8
    #   features = 32 ; batch = 4 ; multiplier = 4  (Dm = 128)
    batch, in_tokens, out_tokens, features, multiplier = 4, (4, 4), (3, 5), 32, 4
    in_rows, out_rows = sum(in_tokens), sum(out_tokens)
    k_params, k_x1, k_x2, key = jax.random.split(key, 4)
    params = init_mixer_link_params(k_params, in_rows, out_rows, features,
                                    multiplier=multiplier)
    x1 = jax.random.normal(k_x1, (batch, in_tokens[0], features), jnp.float32)
    x2 = jax.random.normal(k_x2, (batch, in_tokens[1], features), jnp.float32)

    ys = jax.block_until_ready(mixer_link((x1, x2), params, out_tokens))
    assert len(ys) == len(out_tokens)
    for y, t in zip(ys, out_tokens):
        assert y.shape == (batch, t, features), y.shape
    ys_ref = jax.block_until_ready(mixer_link_reference((x1, x2), params, out_tokens))
    for y, yr in zip(ys, ys_ref):
        np.testing.assert_allclose(np.asarray(y), np.asarray(yr),
                                   rtol=5e-2, atol=5e-2)

    # Case 2: exercises the chunked Dm reduction axis (2 chunks via max_dm_tile).
    batch2, in_tokens2, out_tokens2, features2, mult2 = 2, (8,), (8,), 64, 4
    in_rows2, out_rows2 = sum(in_tokens2), sum(out_tokens2)
    k_params2, k_x, _ = jax.random.split(key, 3)
    params2 = init_mixer_link_params(k_params2, in_rows2, out_rows2, features2,
                                     multiplier=mult2)
    x = jax.random.normal(k_x, (batch2, in_tokens2[0], features2), jnp.float32)
    ys2 = jax.block_until_ready(
        mixer_link((x,), params2, out_tokens2, max_dm_tile=128))
    ys2_ref = jax.block_until_ready(
        mixer_link_reference((x,), params2, out_tokens2))
    for y, yr in zip(ys2, ys2_ref):
        np.testing.assert_allclose(np.asarray(y), np.asarray(yr),
                                   rtol=5e-2, atol=5e-2)

    print("KERNEL_OK")
</pallas_src>

<mosaic_0001>
module attributes {stable_mosaic.version = 11 : i64} {
  func.func @mixer_link_kernel(%arg0: i32, %arg1: i32, %arg2: memref<16x128xbf16, #tpu.memory_space<vmem>>, %arg3: memref<128x128xbf16, #tpu.memory_space<vmem>>, %arg4: memref<1x128xf32, #tpu.memory_space<vmem>>, %arg5: memref<64x16xbf16, #tpu.memory_space<vmem>>, %arg6: memref<64x1xf32, #tpu.memory_space<vmem>>, %arg7: memref<16x64xbf16, #tpu.memory_space<vmem>>, %arg8: memref<16x1xf32, #tpu.memory_space<vmem>>, %arg9: memref<128x128xbf16, #tpu.memory_space<vmem>>, %arg10: memref<1x128xf32, #tpu.memory_space<vmem>>, %arg11: memref<16x128xf32, #tpu.memory_space<vmem>>, %arg12: memref<16x128xf32, #tpu.memory_space<vmem>>) attributes {dimension_semantics = [#tpu.dimension_semantics<parallel>, #tpu.dimension_semantics<arbitrary>], iteration_bounds = array<i64: 2, 1>, scalar_prefetch = 0 : i64, scratch_operands = 1 : i64, tpu.core_type = #tpu.core_type<tc>, window_params = [{transform_indices = @transform_0, window_bounds = array<i64: 16, 128>}, {transform_indices = @transform_1, window_bounds = array<i64: 128, 128>}, {transform_indices = @transform_2, window_bounds = array<i64: 1, 128>}, {pipeline_mode = #tpu.pipeline_mode<synchronous>, transform_indices = @transform_3, window_bounds = array<i64: 64, 16>}, {pipeline_mode = #tpu.pipeline_mode<synchronous>, transform_indices = @transform_4, window_bounds = array<i64: 64, 1>}, {pipeline_mode = #tpu.pipeline_mode<synchronous>, transform_indices = @transform_5, window_bounds = array<i64: 16, 64>}, {pipeline_mode = #tpu.pipeline_mode<synchronous>, transform_indices = @transform_6, window_bounds = array<i64: 16, 1>}, {transform_indices = @transform_7, window_bounds = array<i64: 128, 128>}, {pipeline_mode = #tpu.pipeline_mode<synchronous>, transform_indices = @transform_8, window_bounds = array<i64: 1, 128>}, {transform_indices = @transform_9, window_bounds = array<i64: 16, 128>}]} {
    %c0_i32 = arith.constant 0 : i32
    %0 = arith.cmpi eq, %arg1, %c0_i32 : i32
    %1 = arith.extui %0 : i1 to i32
    %c0_i32_0 = arith.constant 0 : i32
    %2 = arith.cmpi ne, %1, %c0_i32_0 : i32
    scf.if %2 {
      %cst_37 = arith.constant 0.000000e+00 : f32
      %69 = vector.broadcast %cst_37 : f32 to vector<16x128xf32>
      %c0_38 = arith.constant 0 : index
      %c0_39 = arith.constant 0 : index
      %70 = vector.load %arg12[%c0_38, %c0_39] : memref<16x128xf32, #tpu.memory_space<vmem>>, vector<16x128xf32>
      tpu.vector_store %arg12[%c0_38, %c0_39], %69 {strides = array<i32>} : memref<16x128xf32, #tpu.memory_space<vmem>>, vector<16x128xf32>,
    } else {
    }
    %c0 = arith.constant 0 : index
    %c0_1 = arith.constant 0 : index
    %3 = vector.load %arg2[%c0, %c0_1] : memref<16x128xbf16, #tpu.memory_space<vmem>>, vector<16x128xbf16>
    %c0_2 = arith.constant 0 : index
    %c0_3 = arith.constant 0 : index
    %4 = vector.load %arg3[%c0_2, %c0_3] : memref<128x128xbf16, #tpu.memory_space<vmem>>, vector<128x128xbf16>
    %cst = arith.constant dense<0.000000e+00> : vector<16x128xf32>
    %5 = tpu.matmul %3, %4, %cst {dimension_numbers = #tpu.dot_dimension_numbers<[1], [0], [0], [1], [0, 0, 1, 1], [], []>} : vector<16x128xbf16>, vector<128x128xbf16>, vector<16x128xf32> -> vector<16x128xf32>
    %c0_4 = arith.constant 0 : index
    %c0_5 = arith.constant 0 : index
    %6 = vector.load %arg4[%c0_4, %c0_5] : memref<1x128xf32, #tpu.memory_space<vmem>>, vector<1x128xf32>
    %7 = vector.broadcast %6 : vector<1x128xf32> to vector<16x128xf32>
    %8 = arith.addf %5, %7 : vector<16x128xf32>
    %9 = arith.mulf %8, %8 : vector<16x128xf32>
    %10 = arith.mulf %8, %9 : vector<16x128xf32>
    %cst_6 = arith.constant 4.471500e-02 : f32
    %11 = vector.broadcast %cst_6 : f32 to vector<16x128xf32>
    %12 = arith.mulf %11, %10 : vector<16x128xf32>
    %13 = arith.addf %8, %12 : vector<16x128xf32>
    %cst_7 = arith.constant 0.797884583 : f32
    %14 = vector.broadcast %cst_7 : f32 to vector<16x128xf32>
    %15 = arith.mulf %14, %13 : vector<16x128xf32>
    %16 = math.tanh %15 : vector<16x128xf32>
    %cst_8 = arith.constant 1.000000e+00 : f32
    %17 = vector.broadcast %cst_8 : f32 to vector<16x128xf32>
    %18 = arith.addf %17, %16 : vector<16x128xf32>
    %cst_9 = arith.constant 5.000000e-01 : f32
    %19 = vector.broadcast %cst_9 : f32 to vector<16x128xf32>
    %20 = arith.mulf %19, %18 : vector<16x128xf32>
    %21 = arith.mulf %8, %20 : vector<16x128xf32>
    %22 = arith.truncf %21 : vector<16x128xf32> to vector<16x128xbf16>
    %c0_10 = arith.constant 0 : index
    %c0_11 = arith.constant 0 : index
    %23 = vector.load %arg5[%c0_10, %c0_11] : memref<64x16xbf16, #tpu.memory_space<vmem>>, vector<64x16xbf16>
    %cst_12 = arith.constant dense<0.000000e+00> : vector<64x128xf32>
    %24 = tpu.matmul %23, %22, %cst_12 {dimension_numbers = #tpu.dot_dimension_numbers<[1], [0], [0], [1], [0, 0, 1, 1], [], []>} : vector<64x16xbf16>, vector<16x128xbf16>, vector<64x128xf32> -> vector<64x128xf32>
    %c0_13 = arith.constant 0 : index
    %c0_14 = arith.constant 0 : index
    %25 = vector.load %arg6[%c0_13, %c0_14] : memref<64x1xf32, #tpu.memory_space<vmem>>, vector<64x1xf32>
    %26 = vector.broadcast %25 : vector<64x1xf32> to vector<64x128xf32>
    %27 = arith.addf %24, %26 : vector<64x128xf32>
    %28 = arith.mulf %27, %27 : vector<64x128xf32>
    %29 = arith.mulf %27, %28 : vector<64x128xf32>
    %cst_15 = arith.constant 4.471500e-02 : f32
    %30 = vector.broadcast %cst_15 : f32 to vector<64x128xf32>
    %31 = arith.mulf %30, %29 : vector<64x128xf32>
    %32 = arith.addf %27, %31 : vector<64x128xf32>
    %cst_16 = arith.constant 0.797884583 : f32
    %33 = vector.broadcast %cst_16 : f32 to vector<64x128xf32>
    %34 = arith.mulf %33, %32 : vector<64x128xf32>
    %35 = math.tanh %34 : vector<64x128xf32>
    %cst_17 = arith.constant 1.000000e+00 : f32
    %36 = vector.broadcast %cst_17 : f32 to vector<64x128xf32>
    %37 = arith.addf %36, %35 : vector<64x128xf32>
    %cst_18 = arith.constant 5.000000e-01 : f32
    %38 = vector.broadcast %cst_18 : f32 to vector<64x128xf32>
    %39 = arith.mulf %38, %37 : vector<64x128xf32>
    %40 = arith.mulf %27, %39 : vector<64x128xf32>
    %41 = arith.truncf %40 : vector<64x128xf32> to vector<64x128xbf16>
    %c0_19 = arith.constant 0 : index
    %c0_20 = arith.constant 0 : index
    %42 = vector.load %arg7[%c0_19, %c0_20] : memref<16x64xbf16, #tpu.memory_space<vmem>>, vector<16x64xbf16>
    %cst_21 = arith.constant dense<0.000000e+00> : vector<16x128xf32>
    %43 = tpu.matmul %42, %41, %cst_21 {dimension_numbers = #tpu.dot_dimension_numbers<[1], [0], [0], [1], [0, 0, 1, 1], [], []>} : vector<16x64xbf16>, vector<64x128xbf16>, vector<16x128xf32> -> vector<16x128xf32>
    %c0_22 = arith.constant 0 : index
    %c0_23 = arith.constant 0 : index
    %44 = vector.load %arg8[%c0_22, %c0_23] : memref<16x1xf32, #tpu.memory_space<vmem>>, vector<16x1xf32>
    %45 = vector.broadcast %44 : vector<16x1xf32> to vector<16x128xf32>
    %46 = arith.addf %43, %45 : vector<16x128xf32>
    %47 = arith.mulf %46, %46 : vector<16x128xf32>
    %48 = arith.mulf %46, %47 : vector<16x128xf32>
    %cst_24 = arith.constant 4.471500e-02 : f32
    %49 = vector.broadcast %cst_24 : f32 to vector<16x128xf32>
    %50 = arith.mulf %49, %48 : vector<16x128xf32>
    %51 = arith.addf %46, %50 : vector<16x128xf32>
    %cst_25 = arith.constant 0.797884583 : f32
    %52 = vector.broadcast %cst_25 : f32 to vector<16x128xf32>
    %53 = arith.mulf %52, %51 : vector<16x128xf32>
    %54 = math.tanh %53 : vector<16x128xf32>
    %cst_26 = arith.constant 1.000000e+00 : f32
    %55 = vector.broadcast %cst_26 : f32 to vector<16x128xf32>
    %56 = arith.addf %55, %54 : vector<16x128xf32>
    %cst_27 = arith.constant 5.000000e-01 : f32
    %57 = vector.broadcast %cst_27 : f32 to vector<16x128xf32>
    %58 = arith.mulf %57, %56 : vector<16x128xf32>
    %59 = arith.mulf %46, %58 : vector<16x128xf32>
    %60 = arith.truncf %59 : vector<16x128xf32> to vector<16x128xbf16>
    %c0_28 = arith.constant 0 : index
    %c0_29 = arith.constant 0 : index
    %61 = vector.load %arg12[%c0_28, %c0_29] : memref<16x128xf32, #tpu.memory_space<vmem>>, vector<16x128xf32>
    %c0_30 = arith.constant 0 : index
    %c0_31 = arith.constant 0 : index
    %62 = vector.load %arg9[%c0_30, %c0_31] : memref<128x128xbf16, #tpu.memory_space<vmem>>, vector<128x128xbf16>
    %cst_32 = arith.constant dense<0.000000e+00> : vector<16x128xf32>
    %63 = tpu.matmul %60, %62, %cst_32 {dimension_numbers = #tpu.dot_dimension_numbers<[1], [0], [0], [1], [0, 0, 1, 1], [], []>} : vector<16x128xbf16>, vector<128x128xbf16>, vector<16x128xf32> -> vector<16x128xf32>
    %64 = arith.addf %61, %63 : vector<16x128xf32>
    %c0_33 = arith.constant 0 : index
    %c0_34 = arith.constant 0 : index
    %65 = vector.load %arg12[%c0_33, %c0_34] : memref<16x128xf32, #tpu.memory_space<vmem>>, vector<16x128xf32>
    tpu.vector_store %arg12[%c0_33, %c0_34], %64 {strides = array<i32>} : memref<16x128xf32, #tpu.memory_space<vmem>>, vector<16x128xf32>,
    %c0_i32_35 = arith.constant 0 : i32
    %66 = arith.cmpi eq, %arg1, %c0_i32_35 : i32
    %67 = arith.extui %66 : i1 to i32
    %c0_i32_36 = arith.constant 0 : i32
    %68 = arith.cmpi ne, %67, %c0_i32_36 : i32
    scf.if %68 {
      %c0_37 = arith.constant 0 : index
      %c0_38 = arith.constant 0 : index
      %69 = vector.load %arg12[%c0_37, %c0_38] : memref<16x128xf32, #tpu.memory_space<vmem>>, vector<16x128xf32>
      %c0_39 = arith.constant 0 : index
      %c0_40 = arith.constant 0 : index
      %70 = vector.load %arg10[%c0_39, %c0_40] : memref<1x128xf32, #tpu.memory_space<vmem>>, vector<1x128xf32>
      %71 = vector.broadcast %70 : vector<1x128xf32> to vector<16x128xf32>
      %72 = arith.addf %69, %71 : vector<16x128xf32>
      %73 = arith.mulf %72, %72 : vector<16x128xf32>
      %74 = arith.mulf %72, %73 : vector<16x128xf32>
      %cst_41 = arith.constant 4.471500e-02 : f32
      %75 = vector.broadcast %cst_41 : f32 to vector<16x128xf32>
      %76 = arith.mulf %75, %74 : vector<16x128xf32>
      %77 = arith.addf %72, %76 : vector<16x128xf32>
      %cst_42 = arith.constant 0.797884583 : f32
      %78 = vector.broadcast %cst_42 : f32 to vector<16x128xf32>
      %79 = arith.mulf %78, %77 : vector<16x128xf32>
      %80 = math.tanh %79 : vector<16x128xf32>
      %cst_43 = arith.constant 1.000000e+00 : f32
      %81 = vector.broadcast %cst_43 : f32 to vector<16x128xf32>
      %82 = arith.addf %81, %80 : vector<16x128xf32>
      %cst_44 = arith.constant 5.000000e-01 : f32
      %83 = vector.broadcast %cst_44 : f32 to vector<16x128xf32>
      %84 = arith.mulf %83, %82 : vector<16x128xf32>
      %85 = arith.mulf %72, %84 : vector<16x128xf32>
      %c0_45 = arith.constant 0 : index
      %c0_46 = arith.constant 0 : index
      %86 = vector.load %arg11[%c0_45, %c0_46] : memref<16x128xf32, #tpu.memory_space<vmem>>, vector<16x128xf32>
      tpu.vector_store %arg11[%c0_45, %c0_46], %85 {strides = array<i32>} : memref<16x128xf32, #tpu.memory_space<vmem>>, vector<16x128xf32>,
    } else {
    }
    return
  }
  func.func @transform_0(%arg0: i32, %arg1: i32) -> (i32, i32) {
    %c0_i32 = arith.constant 0 : i32
    %c0_i32_0 = arith.constant 0 : i32
    return %arg0, %c0_i32 : i32, i32
  }
  func.func @transform_1(%arg0: i32, %arg1: i32) -> (i32, i32) {
    %c0_i32 = arith.constant 0 : i32
    %c0_i32_0 = arith.constant 0 : i32
    return %c0_i32, %arg1 : i32, i32
  }
  func.func @transform_2(%arg0: i32, %arg1: i32) -> (i32, i32) {
    %c0_i32 = arith.constant 0 : i32
    %c0_i32_0 = arith.constant 0 : i32
    return %c0_i32, %arg1 : i32, i32
  }
  func.func @transform_3(%arg0: i32, %arg1: i32) -> (i32, i32) {
    %c0_i32 = arith.constant 0 : i32
    %c0_i32_0 = arith.constant 0 : i32
    %c0_i32_1 = arith.constant 0 : i32
    return %c0_i32, %c0_i32_0 : i32, i32
  }
  func.func @transform_4(%arg0: i32, %arg1: i32) -> (i32, i32) {
    %c0_i32 = arith.constant 0 : i32
    %c0_i32_0 = arith.constant 0 : i32
    %c0_i32_1 = arith.constant 0 : i32
    return %c0_i32, %c0_i32_0 : i32, i32
  }
  func.func @transform_5(%arg0: i32, %arg1: i32) -> (i32, i32) {
    %c0_i32 = arith.constant 0 : i32
    %c0_i32_0 = arith.constant 0 : i32
    %c0_i32_1 = arith.constant 0 : i32
    return %c0_i32, %c0_i32_0 : i32, i32
  }
  func.func @transform_6(%arg0: i32, %arg1: i32) -> (i32, i32) {
    %c0_i32 = arith.constant 0 : i32
    %c0_i32_0 = arith.constant 0 : i32
    %c0_i32_1 = arith.constant 0 : i32
    return %c0_i32, %c0_i32_0 : i32, i32
  }
  func.func @transform_7(%arg0: i32, %arg1: i32) -> (i32, i32) {
    %c0_i32 = arith.constant 0 : i32
    %c0_i32_0 = arith.constant 0 : i32
    return %arg1, %c0_i32 : i32, i32
  }
  func.func @transform_8(%arg0: i32, %arg1: i32) -> (i32, i32) {
    %c0_i32 = arith.constant 0 : i32
    %c0_i32_0 = arith.constant 0 : i32
    %c0_i32_1 = arith.constant 0 : i32
    return %c0_i32, %c0_i32_0 : i32, i32
  }
  func.func @transform_9(%arg0: i32, %arg1: i32) -> (i32, i32) {
    %c0_i32 = arith.constant 0 : i32
    %c0_i32_0 = arith.constant 0 : i32
    return %arg0, %c0_i32 : i32, i32
  }
}

module attributes {stable_mosaic.version = 11 : i64} {
  func.func @mixer_link_kernel(%arg0: i32, %arg1: i32, %arg2: memref<16x128xbf16, #tpu.memory_space<vmem>>, %arg3: memref<128x128xbf16, #tpu.memory_space<vmem>>, %arg4: memref<1x128xf32, #tpu.memory_space<vmem>>, %arg5: memref<64x16xbf16, #tpu.memory_space<vmem>>, %arg6: memref<64x1xf32, #tpu.memory_space<vmem>>, %arg7: memref<16x64xbf16, #tpu.memory_space<vmem>>, %arg8: memref<16x1xf32, #tpu.memory_space<vmem>>, %arg9: memref<128x128xbf16, #tpu.memory_space<vmem>>, %arg10: memref<1x128xf32, #tpu.memory_space<vmem>>, %arg11: memref<16x128xf32, #tpu.memory_space<vmem>>, %arg12: memref<16x128xf32, #tpu.memory_space<vmem>>) attributes {dimension_semantics = [#tpu.dimension_semantics<parallel>, #tpu.dimension_semantics<arbitrary>], iteration_bounds = array<i64: 2, 1>, scalar_prefetch = 0 : i64, scratch_operands = 1 : i64, tpu.core_type = #tpu.core_type<tc>, window_params = [{transform_indices = @transform_0, window_bounds = array<i64: 16, 128>}, {transform_indices = @transform_1, window_bounds = array<i64: 128, 128>}, {transform_indices = @transform_2, window_bounds = array<i64: 1, 128>}, {pipeline_mode = #tpu.pipeline_mode<synchronous>, transform_indices = @transform_3, window_bounds = array<i64: 64, 16>}, {pipeline_mode = #tpu.pipeline_mode<synchronous>, transform_indices = @transform_4, window_bounds = array<i64: 64, 1>}, {pipeline_mode = #tpu.pipeline_mode<synchronous>, transform_indices = @transform_5, window_bounds = array<i64: 16, 64>}, {pipeline_mode = #tpu.pipeline_mode<synchronous>, transform_indices = @transform_6, window_bounds = array<i64: 16, 1>}, {transform_indices = @transform_7, window_bounds = array<i64: 128, 128>}, {pipeline_mode = #tpu.pipeline_mode<synchronous>, transform_indices = @transform_8, window_bounds = array<i64: 1, 128>}, {transform_indices = @transform_9, window_bounds = array<i64: 16, 128>}]} {
    %c0_i32 = arith.constant 0 : i32
    %0 = arith.cmpi eq, %arg1, %c0_i32 : i32
    %1 = arith.extui %0 : i1 to i32
    %c0_i32_0 = arith.constant 0 : i32
    %2 = arith.cmpi ne, %1, %c0_i32_0 : i32
    scf.if %2 {
      %cst_37 = arith.constant 0.000000e+00 : f32
      %69 = vector.broadcast %cst_37 : f32 to vector<16x128xf32>
      %c0_38 = arith.constant 0 : index
      %c0_39 = arith.constant 0 : index
      %70 = vector.load %arg12[%c0_38, %c0_39] : memref<16x128xf32, #tpu.memory_space<vmem>>, vector<16x128xf32>
      tpu.vector_store %arg12[%c0_38, %c0_39], %69 {strides = array<i32>} : memref<16x128xf32, #tpu.memory_space<vmem>>, vector<16x128xf32>,
    } else {
    }
    %c0 = arith.constant 0 : index
    %c0_1 = arith.constant 0 : index
    %3 = vector.load %arg2[%c0, %c0_1] : memref<16x128xbf16, #tpu.memory_space<vmem>>, vector<16x128xbf16>
    %c0_2 = arith.constant 0 : index
    %c0_3 = arith.constant 0 : index
    %4 = vector.load %arg3[%c0_2, %c0_3] : memref<128x128xbf16, #tpu.memory_space<vmem>>, vector<128x128xbf16>
    %cst = arith.constant dense<0.000000e+00> : vector<16x128xf32>
    %5 = tpu.matmul %3, %4, %cst {dimension_numbers = #tpu.dot_dimension_numbers<[1], [0], [0], [1], [0, 0, 1, 1], [], []>} : vector<16x128xbf16>, vector<128x128xbf16>, vector<16x128xf32> -> vector<16x128xf32>
    %c0_4 = arith.constant 0 : index
    %c0_5 = arith.constant 0 : index
    %6 = vector.load %arg4[%c0_4, %c0_5] : memref<1x128xf32, #tpu.memory_space<vmem>>, vector<1x128xf32>
    %7 = vector.broadcast %6 : vector<1x128xf32> to vector<16x128xf32>
    %8 = arith.addf %5, %7 : vector<16x128xf32>
    %9 = arith.mulf %8, %8 : vector<16x128xf32>
    %10 = arith.mulf %8, %9 : vector<16x128xf32>
    %cst_6 = arith.constant 4.471500e-02 : f32
    %11 = vector.broadcast %cst_6 : f32 to vector<16x128xf32>
    %12 = arith.mulf %11, %10 : vector<16x128xf32>
    %13 = arith.addf %8, %12 : vector<16x128xf32>
    %cst_7 = arith.constant 0.797884583 : f32
    %14 = vector.broadcast %cst_7 : f32 to vector<16x128xf32>
    %15 = arith.mulf %14, %13 : vector<16x128xf32>
    %16 = math.tanh %15 : vector<16x128xf32>
    %cst_8 = arith.constant 1.000000e+00 : f32
    %17 = vector.broadcast %cst_8 : f32 to vector<16x128xf32>
    %18 = arith.addf %17, %16 : vector<16x128xf32>
    %cst_9 = arith.constant 5.000000e-01 : f32
    %19 = vector.broadcast %cst_9 : f32 to vector<16x128xf32>
    %20 = arith.mulf %19, %18 : vector<16x128xf32>
    %21 = arith.mulf %8, %20 : vector<16x128xf32>
    %22 = arith.truncf %21 : vector<16x128xf32> to vector<16x128xbf16>
    %c0_10 = arith.constant 0 : index
    %c0_11 = arith.constant 0 : index
    %23 = vector.load %arg5[%c0_10, %c0_11] : memref<64x16xbf16, #tpu.memory_space<vmem>>, vector<64x16xbf16>
    %cst_12 = arith.constant dense<0.000000e+00> : vector<64x128xf32>
    %24 = tpu.matmul %23, %22, %cst_12 {dimension_numbers = #tpu.dot_dimension_numbers<[1], [0], [0], [1], [0, 0, 1, 1], [], []>} : vector<64x16xbf16>, vector<16x128xbf16>, vector<64x128xf32> -> vector<64x128xf32>
    %c0_13 = arith.constant 0 : index
    %c0_14 = arith.constant 0 : index
    %25 = vector.load %arg6[%c0_13, %c0_14] : memref<64x1xf32, #tpu.memory_space<vmem>>, vector<64x1xf32>
    %26 = vector.broadcast %25 : vector<64x1xf32> to vector<64x128xf32>
    %27 = arith.addf %24, %26 : vector<64x128xf32>
    %28 = arith.mulf %27, %27 : vector<64x128xf32>
    %29 = arith.mulf %27, %28 : vector<64x128xf32>
    %cst_15 = arith.constant 4.471500e-02 : f32
    %30 = vector.broadcast %cst_15 : f32 to vector<64x128xf32>
    %31 = arith.mulf %30, %29 : vector<64x128xf32>
    %32 = arith.addf %27, %31 : vector<64x128xf32>
    %cst_16 = arith.constant 0.797884583 : f32
    %33 = vector.broadcast %cst_16 : f32 to vector<64x128xf32>
    %34 = arith.mulf %33, %32 : vector<64x128xf32>
    %35 = math.tanh %34 : vector<64x128xf32>
    %cst_17 = arith.constant 1.000000e+00 : f32
    %36 = vector.broadcast %cst_17 : f32 to vector<64x128xf32>
    %37 = arith.addf %36, %35 : vector<64x128xf32>
    %cst_18 = arith.constant 5.000000e-01 : f32
    %38 = vector.broadcast %cst_18 : f32 to vector<64x128xf32>
    %39 = arith.mulf %38, %37 : vector<64x128xf32>
    %40 = arith.mulf %27, %39 : vector<64x128xf32>
    %41 = arith.truncf %40 : vector<64x128xf32> to vector<64x128xbf16>
    %c0_19 = arith.constant 0 : index
    %c0_20 = arith.constant 0 : index
    %42 = vector.load %arg7[%c0_19, %c0_20] : memref<16x64xbf16, #tpu.memory_space<vmem>>, vector<16x64xbf16>
    %cst_21 = arith.constant dense<0.000000e+00> : vector<16x128xf32>
    %43 = tpu.matmul %42, %41, %cst_21 {dimension_numbers = #tpu.dot_dimension_numbers<[1], [0], [0], [1], [0, 0, 1, 1], [], []>} : vector<16x64xbf16>, vector<64x128xbf16>, vector<16x128xf32> -> vector<16x128xf32>
    %c0_22 = arith.constant 0 : index
    %c0_23 = arith.constant 0 : index
    %44 = vector.load %arg8[%c0_22, %c0_23] : memref<16x1xf32, #tpu.memory_space<vmem>>, vector<16x1xf32>
    %45 = vector.broadcast %44 : vector<16x1xf32> to vector<16x128xf32>
    %46 = arith.addf %43, %45 : vector<16x128xf32>
    %47 = arith.mulf %46, %46 : vector<16x128xf32>
    %48 = arith.mulf %46, %47 : vector<16x128xf32>
    %cst_24 = arith.constant 4.471500e-02 : f32
    %49 = vector.broadcast %cst_24 : f32 to vector<16x128xf32>
    %50 = arith.mulf %49, %48 : vector<16x128xf32>
    %51 = arith.addf %46, %50 : vector<16x128xf32>
    %cst_25 = arith.constant 0.797884583 : f32
    %52 = vector.broadcast %cst_25 : f32 to vector<16x128xf32>
    %53 = arith.mulf %52, %51 : vector<16x128xf32>
    %54 = math.tanh %53 : vector<16x128xf32>
    %cst_26 = arith.constant 1.000000e+00 : f32
    %55 = vector.broadcast %cst_26 : f32 to vector<16x128xf32>
    %56 = arith.addf %55, %54 : vector<16x128xf32>
    %cst_27 = arith.constant 5.000000e-01 : f32
    %57 = vector.broadcast %cst_27 : f32 to vector<16x128xf32>
    %58 = arith.mulf %57, %56 : vector<16x128xf32>
    %59 = arith.mulf %46, %58 : vector<16x128xf32>
    %60 = arith.truncf %59 : vector<16x128xf32> to vector<16x128xbf16>
    %c0_28 = arith.constant 0 : index
    %c0_29 = arith.constant 0 : index
    %61 = vector.load %arg12[%c0_28, %c0_29] : memref<16x128xf32, #tpu.memory_space<vmem>>, vector<16x128xf32>
    %c0_30 = arith.constant 0 : index
    %c0_31 = arith.constant 0 : index
    %62 = vector.load %arg9[%c0_30, %c0_31] : memref<128x128xbf16, #tpu.memory_space<vmem>>, vector<128x128xbf16>
    %cst_32 = arith.constant dense<0.000000e+00> : vector<16x128xf32>
    %63 = tpu.matmul %60, %62, %cst_32 {dimension_numbers = #tpu.dot_dimension_numbers<[1], [0], [0], [1], [0, 0, 1, 1], [], []>} : vector<16x128xbf16>, vector<128x128xbf16>, vector<16x128xf32> -> vector<16x128xf32>
    %64 = arith.addf %61, %63 : vector<16x128xf32>
    %c0_33 = arith.constant 0 : index
    %c0_34 = arith.constant 0 : index
    %65 = vector.load %arg12[%c0_33, %c0_34] : memref<16x128xf32, #tpu.memory_space<vmem>>, vector<16x128xf32>
    tpu.vector_store %arg12[%c0_33, %c0_34], %64 {strides = array<i32>} : memref<16x128xf32, #tpu.memory_space<vmem>>, vector<16x128xf32>,
    %c0_i32_35 = arith.constant 0 : i32
    %66 = arith.cmpi eq, %arg1, %c0_i32_35 : i32
    %67 = arith.extui %66 : i1 to i32
    %c0_i32_36 = arith.constant 0 : i32
    %68 = arith.cmpi ne, %67, %c0_i32_36 : i32
    scf.if %68 {
      %c0_37 = arith.constant 0 : index
      %c0_38 = arith.constant 0 : index
      %69 = vector.load %arg12[%c0_37, %c0_38] : memref<16x128xf32, #tpu.memory_space<vmem>>, vector<16x128xf32>
      %c0_39 = arith.constant 0 : index
      %c0_40 = arith.constant 0 : index
      %70 = vector.load %arg10[%c0_39, %c0_40] : memref<1x128xf32, #tpu.memory_space<vmem>>, vector<1x128xf32>
      %71 = vector.broadcast %70 : vector<1x128xf32> to vector<16x128xf32>
      %72 = arith.addf %69, %71 : vector<16x128xf32>
      %73 = arith.mulf %72, %72 : vector<16x128xf32>
      %74 = arith.mulf %72, %73 : vector<16x128xf32>
      %cst_41 = arith.constant 4.471500e-02 : f32
      %75 = vector.broadcast %cst_41 : f32 to vector<16x128xf32>
      %76 = arith.mulf %75, %74 : vector<16x128xf32>
      %77 = arith.addf %72, %76 : vector<16x128xf32>
      %cst_42 = arith.constant 0.797884583 : f32
      %78 = vector.broadcast %cst_42 : f32 to vector<16x128xf32>
      %79 = arith.mulf %78, %77 : vector<16x128xf32>
      %80 = math.tanh %79 : vector<16x128xf32>
      %cst_43 = arith.constant 1.000000e+00 : f32
      %81 = vector.broadcast %cst_43 : f32 to vector<16x128xf32>
      %82 = arith.addf %81, %80 : vector<16x128xf32>
      %cst_44 = arith.constant 5.000000e-01 : f32
      %83 = vector.broadcast %cst_44 : f32 to vector<16x128xf32>
      %84 = arith.mulf %83, %82 : vector<16x128xf32>
      %85 = arith.mulf %72, %84 : vector<16x128xf32>
      %c0_45 = arith.constant 0 : index
      %c0_46 = arith.constant 0 : index
      %86 = vector.load %arg11[%c0_45, %c0_46] : memref<16x128xf32, #tpu.memory_space<vmem>>, vector<16x128xf32>
      tpu.vector_store %arg11[%c0_45, %c0_46], %85 {strides = array<i32>} : memref<16x128xf32, #tpu.memory_space<vmem>>, vector<16x128xf32>,
    } else {
    }
    return
  }
  func.func @transform_0(%arg0: i32, %arg1: i32) -> (i32, i32) {
    %c0_i32 = arith.constant 0 : i32
    %c0_i32_0 = arith.constant 0 : i32
    return %arg0, %c0_i32 : i32, i32
  }
  func.func @transform_1(%arg0: i32, %arg1: i32) -> (i32, i32) {
    %c0_i32 = arith.constant 0 : i32
    %c0_i32_0 = arith.constant 0 : i32
    return %c0_i32, %arg1 : i32, i32
  }
  func.func @transform_2(%arg0: i32, %arg1: i32) -> (i32, i32) {
    %c0_i32 = arith.constant 0 : i32
    %c0_i32_0 = arith.constant 0 : i32
    return %c0_i32, %arg1 : i32, i32
  }
  func.func @transform_3(%arg0: i32, %arg1: i32) -> (i32, i32) {
    %c0_i32 = arith.constant 0 : i32
    %c0_i32_0 = arith.constant 0 : i32
    %c0_i32_1 = arith.constant 0 : i32
    return %c0_i32, %c0_i32_0 : i32, i32
  }
  func.func @transform_4(%arg0: i32, %arg1: i32) -> (i32, i32) {
    %c0_i32 = arith.constant 0 : i32
    %c0_i32_0 = arith.constant 0 : i32
    %c0_i32_1 = arith.constant 0 : i32
    return %c0_i32, %c0_i32_0 : i32, i32
  }
  func.func @transform_5(%arg0: i32, %arg1: i32) -> (i32, i32) {
    %c0_i32 = arith.constant 0 : i32
    %c0_i32_0 = arith.constant 0 : i32
    %c0_i32_1 = arith.constant 0 : i32
    return %c0_i32, %c0_i32_0 : i32, i32
  }
  func.func @transform_6(%arg0: i32, %arg1: i32) -> (i32, i32) {
    %c0_i32 = arith.constant 0 : i32
    %c0_i32_0 = arith.constant 0 : i32
    %c0_i32_1 = arith.constant 0 : i32
    return %c0_i32, %c0_i32_0 : i32, i32
  }
  func.func @transform_7(%arg0: i32, %arg1: i32) -> (i32, i32) {
    %c0_i32 = arith.constant 0 : i32
    %c0_i32_0 = arith.constant 0 : i32
    return %arg1, %c0_i32 : i32, i32
  }
  func.func @transform_8(%arg0: i32, %arg1: i32) -> (i32, i32) {
    %c0_i32 = arith.constant 0 : i32
    %c0_i32_0 = arith.constant 0 : i32
    %c0_i32_1 = arith.constant 0 : i32
    return %c0_i32, %c0_i32_0 : i32, i32
  }
  func.func @transform_9(%arg0: i32, %arg1: i32) -> (i32, i32) {
    %c0_i32 = arith.constant 0 : i32
    %c0_i32_0 = arith.constant 0 : i32
    return %arg0, %c0_i32 : i32, i32
  }
}

</mosaic_0001>

<bundles_post_ra>
// kernel: tpu_custom_call.1
= control target key start
LH: loop header
LB: loop body
LE: loop exit
PB: predicated region body
PF: predicated region fallthrough
CT: control target
= control target key end

     0   :  { %s2054_s0 = inlined_call_operand.hbm [shape: bf16[32,128], index: 0, kind: input, shape index: {}]   ;;  %s2055_s1 = inlined_call_operand.vmem [shape: bf16[128,128], index: 1, kind: input, shape index: {}]   ;;  %s2056_s2 = inlined_call_operand.hbm [shape: f32[1,128], index: 2, kind: input, shape index: {}]   ;;  %s2057_s3 = inlined_call_operand.vmem [shape: bf16[64,16], index: 3, kind: input, shape index: {}]   ;;  %s2058_s4 = inlined_call_operand.vmem [shape: f32[64,1], index: 4, kind: input, shape index: {}]   ;;  %s2059_s5 = inlined_call_operand.vmem [shape: bf16[16,64], index: 5, kind: input, shape index: {}]   ;;  %s2060_s6 = inlined_call_operand.vmem [shape: f32[16,1], index: 6, kind: input, shape index: {}]   ;;  %s2061_s7 = inlined_call_operand.vmem [shape: bf16[128,128], index: 7, kind: input, shape index: {}]   ;;  %s2062_s8 = inlined_call_operand.vmem [shape: f32[1,128], index: 8, kind: input, shape index: {}]   ;;  %s2063_s9 = inlined_call_operand.hbm [shape: f32[32,128], index: 9, kind: output, shape index: {}]  }
   0x1   :  { %2075 = sst [smem:[#allocation15_spill]] %s2063_s9 }
   0x2   :  { %14 = vsyncpa [#allocation4], 0 }
   0x3   :  { %16 = vsyncpa [#allocation4 + $0x1], 0 }
   0x4   :  { %17 = vsyncpa [#allocation7], 0 }
   0x5   :  { %18 = vsyncpa [#allocation5], 0 }
   0x6   :  { %20 = vsyncpa [#allocation5 + $0x1], 0  ;;  %s1643_s30 = smov 0   ;;  %s1645_s10 = smov 0  }
   0x7   :  { %s1647_s11 = smov 0   ;;  %s1649_s12 = smov 0  }
   0x8   :  { %s1651_s13 = smov 0   ;;  %s1653_s14 = smov 0  }
   0x9 LB: > { %2076 = sst [smem:[#allocation12_spill]] %s1561_s30  ;;  %s1165_s15 = sadd.s32 4294967295, %s1581_s14   ;;  %s1581_s14 = sphi %s1653_s14, %s2106_s14   ;;  %s1577_s13 = sphi %s1651_s13, %s2105_s13   ;;  %s1573_s12 = sphi %s1649_s12, %s2104_s12   ;;  %s1569_s11 = sphi %s1647_s11, %s2103_s11   ;;  %s1565_s10 = sphi %s1645_s10, %s2102_s10   ;;  %s1561_s30 = sphi %s1643_s30, %s2101_s30  }
   0xa   : > { %2077 = sst [smem:[#allocation13_spill]] %s1581_s14  ;;  %s1166_s16 = sadd.s32 4294967294, %s1581_s14  }
   0xb   : > { %p52_p0 = scmp.ne.s32.totalorder %s1569_s11, %s1565_s10  ;;  %p53_p1 = scmp.eq.s32.totalorder %s1581_s14, 0 }
   0xc   : > { %p58_p2 = scmp.ne.s32.totalorder %s1565_s10, %s1561_s30  ;;  %p1681_p3 = scmp.eq.s32.totalorder %s1165_s15, 0 }
   0xd   : > { %p265_p4 = scmp.eq.s32.totalorder %s1165_s15, 1  ;;  %p1685_p5 = por %p53_p1, %p52_p0 }
   0xe   : > { %s2078_s18 = scalar_select %p1681_p3, 1, 0 }
   0xf   : > { %p271_p6 = scmp.eq.s32.totalorder %s1166_s16, 1  ;;  %p1691_p7 = por %p1681_p3, %p58_p2 }
  0x10   : > { %p1695_p8 = por %p265_p4, %p52_p0  ;;  %p1167_p10 = scmp.ge.s32.totalorder %s1581_s14, 1 }
  0x11   : > { %s2080_s20 = scalar_select %p1691_p7, 1, 0 }
  0x12   : > { %s2081_s21 = scalar_select %p1695_p8, 1, 0 }
  0x13   : > { %p1699_p9 = por %p271_p6, %p58_p2  ;;  %p278_p11 = scmp.lt.s32.totalorder %s1581_s14, 3 }
  0x14   : > { %s1583_s24 = smov [#allocation6]   ;;  %p1326_p1 = scmp.lt.s32.totalorder %s1581_s14, 2 }
  0x15   : > { %s2082_s22 = scalar_select %p1699_p9, 1, 0 }
  0x16   : > { %p1706_p13 = pnand %p1167_p10, %p278_p11  ;;  %s300_s25 = sshll.u32 %s1583_s24, 4  ;;  %s301_s25 = int_to_ptr.vmem [resolvable:$true] %s300_s25 }
  0x17   : > { %2083 = sst [smem:[#allocation14_spill]] %s2082_s22  ;;  %p1715_p4 = pnand %p1326_p1, %p1685_p5 }
  0x18   : > { %s2084_s23 = scalar_select %p1706_p13, 1, 0 }
  0x19   : > { %p1313_p0 = pneg %p1706_p13  ;;  %s38_s28 = sadd.s32 1, %s1577_s13 }
  0x1a   : > { %s2085_s26 = scalar_select %p1715_p4, 1, 0 }
  0x1b   : > { %p1721_p2 = pnand %p1313_p0, %p1681_p3  ;;  %p1726_p6 = scmp.ge.s32.totalorder %s38_s28, 2 }
  0x1c   : > { %s335_s15 = sand.u32 1, %s1569_s11   ;;  %s1437_s19 = scalar_lea.hbm %s2056_s2, 16 }
  0x1d   : > { %s2087_s29 = scalar_select %p1726_p6, 1, 0 }
  0x1e   : > { %p1438_p5 = scmp.ne.s32.totalorder %s2056_s2, %s1437_s19  ;;  %p1439_p10 = pneg %p1721_p2 }
  0x1f   : > { %p1444_p0 = scmp.lt.u32.totalorder %s1437_s19, %s2056_s2 }
  0x20   : > { %p1440_p11 = pnand %p1439_p10, %p1438_p5 }
  0x22   : > { %p1441_p1 = pneg %p1440_p11 }
  0x24   : > { %p1446_p12 = pnand %p1444_p0, %p1441_p1 }
  0x26   : > { %1449 = shalt.err (!%p1446_p12)
}
  0x27   : > { %s1450_s9 = scalar_lea.vmem %s301_s25, 16  ;;  %s1457_s16 = scalar_lea.vmem %s301_s25, 32 }
  0x28   : > { %p1451_p9 = scmp.ne.s32.totalorder %s301_s25, %s1450_s9  ;;  %p1458_p7 = scmp.lt.s32.totalorder %s301_s25, %s301_s25 }
  0x29   : > { %p1459_p13 = scmp.lt.s32.totalorder %s1457_s16, %s1450_s9 }
  0x2a   : > { %p1453_p8 = pnand %p1451_p9, %p1439_p10 }
  0x2b   : > { %p1460_p4 = por %p1459_p13, %p1458_p7 }
  0x2c   : > { %p1454_p3 = pneg %p1453_p8 }
  0x2e   : > { %p1461_p6 = pnand %p1460_p4, %p1454_p3 }
  0x30   : > { %1464 = shalt.err (!%p1461_p6)
}
  0x31   : > { %1316 = dma.hbm_to_vmem [thread:$0]  (!%p1721_p2), %s2056_s2, 16, %s301_s25, [#allocation7]  }
  0x32   : > { %p2088_p8 = scmp.ne.s32.totalorder %s2087_s29, 0  ;;  %s1172_s9 = sshll.u32 %s335_s15, 3 }
  0x33   : > { %s1213_s22 = sshll.u32 %s1577_s13, 7  ;;  %s339_s16 = scalar_lea.vmem [#allocation3], %s1172_s9 }
  0x34   : > { %s2108_s28 = smov (%p2088_p8, %s38_s28), 0  ;;  %s1759_s19 = scalar_lea.hbm %s2054_s0, %s1213_s22 }
  0x35   : > { %s42_s30 = ssub.s32 %s1577_s13, %s2108_s28  ;;  %s346_s25 = sshll.u32 %s339_s16, 4  ;;  %s1766_s25 = int_to_ptr.vmem [resolvable:$true] %s346_s25 }
  0x36   : > { %p43_p3 = scmp.eq.s32.totalorder %s42_s30, 0  ;;  %s2089_s29 = sadd.s32 1, %s1569_s11 }
  0x37   : > { %s1770_s17 = scalar_lea.sflag [#allocation4], %s335_s15  ;;  %s1465_s30 = scalar_lea.hbm %s1759_s19, 128 }
  0x38   : > { %s1764_s14 = scalar_select %p43_p3, %s1569_s11, %s2089_s29  }
  0x39   : > { %p1466_p7 = scmp.ne.s32.totalorder %s1759_s19, %s1465_s30  ;;  %p2090_p9 = scmp.ne.s32.totalorder %s2085_s26, 0 }
  0x3a   : > { %s1470_s9 = scalar_lea.hbm %s2054_s0, 256  ;;  %p1471_p2 = scmp.lt.u32.totalorder %s1759_s19, %s2054_s0 }
  0x3b   : > { %p1467_p12 = pneg %p2090_p9  ;;  %p1472_p6 = scmp.lt.u32.totalorder %s1470_s9, %s1465_s30 }
  0x3c   : > { %p1474_p10 = scmp.lt.u32.totalorder %s1465_s30, %s1759_s19 }
  0x3d   : > { %p1468_p13 = pnand %p1467_p12, %p1466_p7  ;;  %p1473_p5 = por %p1472_p6, %p1471_p2 }
  0x3f   : > { %p1469_p4 = pneg %p1468_p13  ;;  %p1475_p11 = por %p1474_p10, %p1473_p5 }
  0x41   : > { %p1476_p1 = pnand %p1475_p11, %p1469_p4 }
  0x43   : > { %1479 = shalt.err (!%p1476_p1)
}
  0x44   : > { %s1480_s15 = scalar_lea.vmem %s1766_s25, 128  ;;  %s1584_s29 = smov [#allocation3]  }
  0x45   : > { %p1481_p0 = scmp.ne.s32.totalorder %s1766_s25, %s1480_s15  ;;  %s1485_s22 = sshll.u32 %s1584_s29, 4  ;;  %s1486_s22 = int_to_ptr.vmem [resolvable:$false] %s1485_s22 }
  0x46   : > { %s1487_s27 = scalar_lea.vmem %s1486_s22, 256  ;;  %p1488_p7 = scmp.lt.s32.totalorder %s1766_s25, %s1486_s22 }
  0x47   : > { %p1483_p8 = pnand %p1481_p0, %p1467_p12  ;;  %p1489_p13 = scmp.lt.s32.totalorder %s1487_s27, %s1480_s15 }
  0x49   : > { %p1484_p3 = pneg %p1483_p8  ;;  %p1490_p2 = por %p1489_p13, %p1488_p7 }
  0x4b   : > { %p1491_p6 = pnand %p1490_p2, %p1484_p3 }
  0x4d   : > { %1494 = shalt.err (!%p1491_p6)
}
  0x4e   : > { %s1585_s30 = smov 64   ;;  %s1586_s9 = smov 4  }
  0x4f   : > { %1320 = dma.hbm_to_vmem [thread:$0]  (!%p2090_p9), %s1759_s19, 128, %s1766_s25, %s1770_s17, %s1585_s30, %s1585_s30, %s1586_s9  }
  0x50   : > { %p2091_p12 = scmp.ne.s32.totalorder %s2084_s23, 0 }
  0x51   : > { %s1801_s24 = sand.u32 (!%p2091_p12), 1, %s1565_s10   ;;  %p2092_p4 = scmp.ne.s32.totalorder (!%p2091_p12), %s2080_s20, 0 }
  0x52   : > { %358 = sbr.rel (%p2091_p12) target bundleno = 1140 (0x474), region = 56  ;;  %s1176_s16 = sshll.u32 (!%p2091_p12), %s1801_s24, 3 }
  0x53   : > { %s361_s15 = scalar_lea.sflag (!%p2091_p12), [#allocation4], %s1801_s24  ;;  %s1805_s29 = scalar_lea.vmem (!%p2091_p12), [#allocation3], %s1176_s16 }
  0x59   : > { %1548 = dma.done.wait (%p2092_p4), %s361_s15, 128  }
  0x5a   : > { %1550 = vsyncadd (%p2092_p4), %s361_s15, 4294967168  ;;  %p2093_p9 = scmp.ne.s32.totalorder %s2078_s18, 0 }
  0x5c   : > { %1552 = dma.done.wait (%p2093_p9), [#allocation7], 16  }
  0x5d   : > { %1554 = vsyncadd (%p2093_p9), [#allocation7], 4294967280  ;;  %v1587_v0 = vmov 0.0   ;;  %vm1588_vm0 = vmmov 0   ;;  %v1387_v1 = vld [vmem:[%s2055_s1] sm:$0xff]   ;;  %v1388_v2 = vld [vmem:[%s2055_s1 + $0x8] sm:$0xff]  }
  0x5e   : > { %1243 = vmatprep.subr.bf16.mxu0 %v1587_v0  ;;  %1259 = vmatprep.mubr.msk.bf16.mxu0 %vm1588_vm0, %v1587_v0  ;;  %v1389_v3 = vld [vmem:[%s2055_s1 + $0x10] sm:$0xff]   ;;  %v1390_v4 = vld [vmem:[%s2055_s1 + $0x18] sm:$0xff]   ;;  %v1391_v5 = vld [vmem:[%s2055_s1 + $0x20] sm:$0xff]   ;;  %vm646_vm1 = vcmask 130048   ;;  %v1589_v13 = vmov 0   ;;  %vm819_vm2 = vcmask 523264  }
  0x5f   : > { %1273 = vmatprep.subr.bf16.mxu1 %v1587_v0  ;;  %1281 = vmatprep.mubr.msk.bf16.mxu1 %vm1588_vm0, %v1587_v0  ;;  %v1392_v6 = vld [vmem:[%s2055_s1 + $0x28] sm:$0xff]   ;;  %v1393_v7 = vld [vmem:[%s2055_s1 + $0x30] sm:$0xff]   ;;  %v1394_v8 = vld [vmem:[%s2055_s1 + $0x38] sm:$0xff]   ;;  %s1214_s30 = sshll.u32 %s1573_s12, 8  ;;  %s2094_s23 = sld [smem:[#allocation15_spill]] }
  0x60   : > { %1244 = vmatpush3.bf16.msra.mxu0 %v1387_v1  ;;  %v1395_v9 = vld [vmem:[%s1805_s29] sm:$0xff]   ;;  %v580_v12 = vld [vmem:[%s2058_s4 + $0x10] sm:$0xff]  ;;  %1385 = vset.pattern.permute.xlu0 %v1589_v13  ;;  %v581_v15 = vld [vmem:[%s2058_s4 + $0x18] sm:$0xff]  ;;  %s1178_s29 = sshll.u32 %s1801_s24, 4  ;;  %s1029_s18 = scalar_lea.sflag [#allocation5], %s1801_s24 }
  0x61   : > { %1245 = vmatprep.subr.bf16.mxu0 %v1587_v0  ;;  %v1396_v10 = vld [vmem:[%s2057_s3] sm:$0xff]   ;;  %1386 = vset.pattern.permute.xlu1 %v1589_v13  ;;  %v579_v14 = vld [vmem:[%s2058_s4 + $0x8] sm:$0xff]  ;;  %v584_v18 = vld [vmem:[%s2058_s4 + $0x30] sm:$0xff]  ;;  %s411_s9 = scalar_lea.vmem [#allocation8], %s1178_s29  ;;  %p2095_p10 = scmp.ne.s32.totalorder %s2081_s21, 0 }
  0x62   : > { %v578_v11 = vld [vmem:[%s2058_s4] sm:$0xff]  ;;  %598 = vperm.xlu1 %1386, %v580_v12   ;;  %v583_v17 = vld [vmem:[%s2058_s4 + $0x28] sm:$0xff]  ;;  %v585_v19 = vld [vmem:[%s2058_s4 + $0x38] sm:$0xff]  ;;  %s1042_s16 = sshll.u32 %s411_s9, 4  ;;  %s1590_s12 = smov [#allocation8]   ;;  %s2005_s16 = int_to_ptr.vmem [resolvable:$true] %s1042_s16 }
  0x63   : > { %588 = vperm.xlu0 %1385, %v578_v11   ;;  %v582_v16 = vld [vmem:[%s2058_s4 + $0x20] sm:$0xff]  ;;  %v803_v21 = vld [vmem:[%s2060_s6 + $0x8] sm:$0xff]  ;;  %v1179_v22 = vld [vmem:[#allocation6] ss:$0 sm:$0xff]  ;;  %s1495_s19 = scalar_lea.vmem %s2005_s16, 256  ;;  %s1499_s25 = sshll.u32 %s1590_s12, 4  ;;  %s1500_s25 = int_to_ptr.vmem [resolvable:$false] %s1499_s25 }
  0x64   : > { %1246 = vmatpush3.bf16.msra.mxu0 %v1388_v2  ;;  %v802_v20 = vld [vmem:[%s2060_s6] sm:$0xff]  ;;  %v1397_v48 = vld [vmem:[%s2057_s3 + $0x8] sm:$0xff]   ;;  %v1398_v49 = vld [vmem:[%s2057_s3 + $0x10] sm:$0xff]   ;;  %p1496_p5 = scmp.ne.s32.totalorder %s2005_s16, %s1495_s19  ;;  %s1501_s17 = scalar_lea.vmem %s1500_s25, 512 }
  0x65   : > { %1247 = vmatprep.subr.bf16.mxu0 %v1587_v0  ;;  %v1399_v50 = vld [vmem:[%s2057_s3 + $0x18] sm:$0xff]   ;;  %s2003_s26 = scalar_lea.hbm %s2094_s23, %s1214_s30  ;;  %p1502_p0 = scmp.lt.s32.totalorder %s2005_s16, %s1500_s25 }
  0x66   : > { %603 = vperm.xlu1 %1386, %v581_v15   ;;  %p1497_p11 = pnand %p1496_p5, %p2095_p10  ;;  %p1503_p8 = scmp.lt.s32.totalorder %s1501_s17, %s1495_s19 }
  0x67   : > { %593 = vperm.xlu0 %1385, %v579_v14  }
  0x68   : > { %1248 = vmatpush3.bf16.msra.mxu0 %v1389_v3  ;;  %p1498_p1 = pneg %p1497_p11  ;;  %p1504_p3 = por %p1503_p8, %p1502_p0 }
  0x69   : > { %1249 = vmatprep.subr.bf16.mxu0 %v1587_v0 }
  0x6a   : > { %613 = vperm.xlu1 %1386, %v583_v17   ;;  %p1505_p7 = pnand %p1504_p3, %p1498_p1 }
  0x6b   : > { %608 = vperm.xlu0 %1385, %v582_v16  }
  0x6c   : > { %1250 = vmatpush3.bf16.msra.mxu0 %v1390_v4 }
  0x6d   : > { %1251 = vmatprep.subr.bf16.mxu0 %v1587_v0 }
  0x6e   : > { %623 = vperm.xlu1 %1386, %v585_v19  }
  0x6f   : > { %618 = vperm.xlu0 %1385, %v584_v18  }
  0x70   : > { %1252 = vmatpush3.bf16.msra.mxu0 %v1391_v5 }
  0x71   : > { %1253 = vmatprep.subr.bf16.mxu0 %v1587_v0 }
  0x72   : > { %811 = vperm.xlu1 %1386, %v803_v21  }
  0x73   : > { %806 = vperm.xlu0 %1385, %v802_v20  }
  0x74   : > { %1254 = vmatpush3.bf16.msra.mxu0 %v1392_v6 }
  0x75   : > { %1255 = vmatprep.subr.bf16.mxu0 %v1587_v0 }
  0x78   : > { %1256 = vmatpush3.bf16.msra.mxu0 %v1393_v7 }
  0x79   : > { %1257 = vmatprep.subr.bf16.mxu0 %v1587_v0 }
  0x7c   : > { %1258 = vmatpush3.bf16.msra.mxu0 %v1394_v8 }
  0x7f   : > { %1260 = vmatmul.mubr.bf16.vlgmr.msra.gmra.mrb[0].mxu0 %v1395_v9 }
  0x80   : > { %1265 = vmatprep.mubr.msk.bf16.mxu0 %vm646_vm1, %v1396_v10 }
  0xe1   : > { %v599_v52 = vpop.permute.xlu1 %598 }
  0xe2   : > { %v589_v51 = vpop.permute.xlu0 %588 }
  0xe5   : > { %v604_v54 = vpop.permute.xlu1 %603 }
  0xe6   : > { %v594_v53 = vpop.permute.xlu0 %593 }
  0xe9   : > { %v614_v1 = vpop.permute.xlu1 %613 }
  0xea   : > { %v609_v58 = vpop.permute.xlu0 %608 }
  0xed   : > { %v624_v20 = vpop.permute.xlu1 %623 }
  0xee   : > { %v619_v10 = vpop.permute.xlu0 %618 }
 0x152   : > { %v544_v23 = vpop.f32.mrb[0].mxu0 }
 0x153   : > { %v545_v24 = vadd.f32 %v1179_v22, %v544_v23  ;;  %v1261_v25 = vpop.f32.mrb[1].mxu0 }
 0x154   : > { %v547_v26 = vpop.f32.mrb[2].mxu0 }
 0x155   : > { %v551_v27 = vmul.f32 %v545_v24, %v545_v24  ;;  %v548_v28 = vadd.f32 %v1179_v22, %v547_v26  ;;  %v1262_v29 = vpop.f32.mrb[3].mxu0 }
 0x157   : > { %v553_v30 = vmul.f32 %v551_v27, %v545_v24  ;;  %v552_v31 = vmul.f32 %v548_v28, %v548_v28 }
 0x159   : > { %v555_v32 = vmul.f32 0.044715, %v553_v30  ;;  %v554_v33 = vmul.f32 %v552_v31, %v548_v28 }
 0x15b   : > { %v557_v34 = vadd.f32 %v555_v32, %v545_v24  ;;  %v556_v35 = vmul.f32 0.044715, %v554_v33 }
 0x15d   : > { %v559_v36 = vmul.f32 0.7978846, %v557_v34  ;;  %v558_v37 = vadd.f32 %v556_v35, %v548_v28 }
 0x15f   : > { %1409 = vtanh.f32 %v559_v36  ;;  %v560_v38 = vmul.f32 0.7978846, %v558_v37 }
 0x161   : > { %1411 = vtanh.f32 %v560_v38 }
 0x169   : > { %v1410_v39 = vpop.eup %1409 }
 0x16a   : > { %v563_v40 = vadd.f32 1.0, %v1410_v39 }
 0x16b   : > { %v1412_v41 = vpop.eup %1411 }
 0x16c   : > { %v564_v42 = vadd.f32 1.0, %v1412_v41  ;;  %v565_v43 = vmul.f32 0.5, %v563_v40 }
 0x16e   : > { %v566_v44 = vmul.f32 0.5, %v564_v42  ;;  %v567_v45 = vmul.f32 %v565_v43, %v545_v24 }
 0x170   : > { %v568_v46 = vmul.f32 %v566_v44, %v548_v28 }
 0x172   : > { %v569_v47 = vpack.c.bf16 %v568_v46, %v567_v45 }
 0x174   : > { %1263 = vmatprep.subr.bf16.mxu0 %v569_v47 }
 0x175   : > { %1264 = vmatpush3.bf16.msra.mxu0 %v569_v47 }
 0x178   : > { %1266 = vmatmul.mubr.msk.bf16.vlgmr.msra.gmra.mrb[4].mxu0 %vm646_vm1, %v1397_v48 }
 0x179   : > { %1269 = vmatprep.mubr.msk.bf16.mxu0 %vm646_vm1, %v1398_v49 }
 0x180   : > { %1270 = vmatmul.mubr.msk.bf16.gmra.mrb[8].mxu0 %vm646_vm1, %v1399_v50 }
 0x24b   : > { %v1267_v55 = vpop.f32.mrb[4].mxu0 }
 0x24c   : > { %v1899_v56 = vadd.f32 %v1267_v55, %v599_v52  ;;  %v693_v57 = vpop.f32.mrb[5].mxu0 }
 0x24d   : > { %v1901_v59 = vadd.f32 %v693_v57, %v589_v51  ;;  %v1268_v60 = vpop.f32.mrb[6].mxu0 }
 0x24e   : > { %v726_v61 = vmul.f32 %v1899_v56, %v1899_v56  ;;  %v1905_v62 = vadd.f32 %v1268_v60, %v604_v54  ;;  %v696_v63 = vpop.f32.mrb[7].mxu0 }
 0x24f   : > { %v724_v2 = vmul.f32 %v1901_v59, %v1901_v59  ;;  %v1909_v3 = vadd.f32 %v696_v63, %v594_v53 }
 0x250   : > { %v734_v4 = vmul.f32 %v726_v61, %v1899_v56  ;;  %v727_v5 = vmul.f32 %v1905_v62, %v1905_v62 }
 0x251   : > { %v732_v6 = vmul.f32 %v724_v2, %v1901_v59  ;;  %v725_v7 = vmul.f32 %v1909_v3, %v1909_v3 }
 0x252   : > { %v742_v8 = vmul.f32 0.044715, %v734_v4  ;;  %v735_v9 = vmul.f32 %v727_v5, %v1905_v62 }
 0x253   : > { %v740_v11 = vmul.f32 0.044715, %v732_v6  ;;  %v733_v12 = vmul.f32 %v725_v7, %v1909_v3  ;;  %v1271_v13 = vpop.f32.mrb[8].mxu0 }
 0x254   : > { %v750_v14 = vadd.f32 %v742_v8, %v1899_v56  ;;  %v743_v15 = vmul.f32 0.044715, %v735_v9  ;;  %v1920_v16 = vadd.f32 %v1271_v13, %v619_v10  ;;  %v709_v17 = vpop.f32.mrb[9].mxu0 }
 0x255   : > { %v748_v18 = vadd.f32 %v740_v11, %v1901_v59  ;;  %v741_v19 = vmul.f32 0.044715, %v733_v12  ;;  %v1923_v21 = vadd.f32 %v709_v17, %v609_v58  ;;  %v1272_v22 = vpop.f32.mrb[10].mxu0 }
 0x256   : > { %v758_v23 = vmul.f32 0.7978846, %v750_v14  ;;  %v751_v24 = vadd.f32 %v743_v15, %v1905_v62  ;;  %v730_v25 = vmul.f32 %v1920_v16, %v1920_v16  ;;  %v1928_v26 = vadd.f32 %v1272_v22, %v624_v20  ;;  %v712_v27 = vpop.f32.mrb[11].mxu0 }
 0x257   : > { %v756_v28 = vmul.f32 0.7978846, %v748_v18  ;;  %v749_v29 = vadd.f32 %v741_v19, %v1909_v3  ;;  %v728_v30 = vmul.f32 %v1923_v21, %v1923_v21  ;;  %v1933_v31 = vadd.f32 %v712_v27, %v614_v1 }
 0x258   : > { %1413 = vtanh.f32 %v758_v23  ;;  %v759_v32 = vmul.f32 0.7978846, %v751_v24  ;;  %v738_v33 = vmul.f32 %v730_v25, %v1920_v16  ;;  %v731_v34 = vmul.f32 %v1928_v26, %v1928_v26 }
 0x259   : > { %v757_v35 = vmul.f32 0.7978846, %v749_v29  ;;  %v736_v36 = vmul.f32 %v728_v30, %v1923_v21  ;;  %v729_v37 = vmul.f32 %v1933_v31, %v1933_v31  ;;  %1415 = vtanh.f32 %v756_v28  ;;  %v1400_v28 = vld [vmem:[%s2059_s5] sm:$0xff]   ;;  %v1404_v29 = vld [vmem:[%s2061_s7 + $0x18] sm:$0xff]  }
 0x25a   : > { %1417 = vtanh.f32 %v759_v32  ;;  %v746_v38 = vmul.f32 0.044715, %v738_v33  ;;  %v739_v39 = vmul.f32 %v731_v34, %v1928_v26  ;;  %v1405_v30 = vld [vmem:[%s2061_s7 + $0x20] sm:$0xff]   ;;  %v1407_v32 = vld [vmem:[%s2061_s7 + $0x30] sm:$0xff]   ;;  %v1408_v33 = vld [vmem:[%s2061_s7 + $0x38] sm:$0xff]   ;;  %v807_v34 = vpop.permute.xlu0 %806 }
 0x25b   : > { %v744_v40 = vmul.f32 0.044715, %v736_v36  ;;  %v737_v41 = vmul.f32 %v729_v37, %v1933_v31  ;;  %1419 = vtanh.f32 %v757_v35 }
 0x25c   : > { %v754_v42 = vadd.f32 %v746_v38, %v1920_v16  ;;  %v747_v43 = vmul.f32 0.044715, %v739_v39  ;;  %v812_v38 = vpop.permute.xlu1 %811 }
 0x25d   : > { %v752_v44 = vadd.f32 %v744_v40, %v1923_v21  ;;  %v745_v45 = vmul.f32 0.044715, %v737_v41 }
 0x25e   : > { %v762_v46 = vmul.f32 0.7978846, %v754_v42  ;;  %v755_v47 = vadd.f32 %v747_v43, %v1928_v26 }
 0x25f   : > { %v760_v48 = vmul.f32 0.7978846, %v752_v44  ;;  %v753_v49 = vadd.f32 %v745_v45, %v1933_v31 }
 0x260   : > { %1421 = vtanh.f32 %v762_v46  ;;  %v763_v50 = vmul.f32 0.7978846, %v755_v47 }
 0x261   : > { %1423 = vtanh.f32 %v760_v48  ;;  %v761_v51 = vmul.f32 0.7978846, %v753_v49 }
 0x262   : > { %v1414_v52 = vpop.eup %1413  ;;  %1425 = vtanh.f32 %v763_v50 }
 0x263   : > { %v1416_v53 = vpop.eup %1415  ;;  %1427 = vtanh.f32 %v761_v51  ;;  %v774_v54 = vadd.f32 1.0, %v1414_v52 }
 0x264   : > { %v1418_v55 = vpop.eup %1417  ;;  %v772_v57 = vadd.f32 1.0, %v1416_v53 }
 0x265   : > { %v1420_v58 = vpop.eup %1419  ;;  %v775_v60 = vadd.f32 1.0, %v1418_v55  ;;  %v782_v61 = vmul.f32 0.5, %v774_v54 }
 0x266   : > { %v773_v63 = vadd.f32 1.0, %v1420_v58  ;;  %v780_v1 = vmul.f32 0.5, %v772_v57 }
 0x267   : > { %v783_v2 = vmul.f32 0.5, %v775_v60  ;;  %v790_v5 = vmul.f32 %v782_v61, %v1899_v56 }
 0x268   : > { %v781_v4 = vmul.f32 0.5, %v773_v63  ;;  %v788_v8 = vmul.f32 %v780_v1, %v1901_v59  ;;  %v1207_v63 = vld [vmem:[%s2062_s8] ss:$0 sm:$0xff] }
 0x269   : > { %v791_v6 = vmul.f32 %v783_v2, %v1905_v62 }
 0x26a   : > { %v1422_v7 = vpop.eup %1421  ;;  %v789_v9 = vmul.f32 %v781_v4, %v1909_v3 }
 0x26b   : > { %v1424_v10 = vpop.eup %1423  ;;  %v797_v11 = vpack.c.bf16 %v791_v6, %v790_v5  ;;  %v778_v12 = vadd.f32 1.0, %v1422_v7 }
 0x26c   : > { %v1426_v13 = vpop.eup %1425  ;;  %v796_v14 = vpack.c.bf16 %v789_v9, %v788_v8  ;;  %v776_v15 = vadd.f32 1.0, %v1424_v10 }
 0x26d   : > { %v1428_v17 = vpop.eup %1427  ;;  %v779_v18 = vadd.f32 1.0, %v1426_v13  ;;  %v786_v19 = vmul.f32 0.5, %v778_v12 }
 0x26e   : > { %1274 = vmatpush3.bf16.msra.mxu1 %v796_v14  ;;  %v777_v20 = vadd.f32 1.0, %v1428_v17  ;;  %v784_v22 = vmul.f32 0.5, %v776_v15 }
 0x26f   : > { %1275 = vmatprep.subr.bf16.mxu1 %v1587_v0  ;;  %v787_v56 = vmul.f32 0.5, %v779_v18  ;;  %v794_v59 = vmul.f32 %v786_v19, %v1920_v16  ;;  %v1401_v16 = vld [vmem:[%s2061_s7] sm:$0xff]  }
 0x270   : > { %v785_v62 = vmul.f32 0.5, %v777_v20  ;;  %v792_v23 = vmul.f32 %v784_v22, %v1923_v21  ;;  %v1402_v21 = vld [vmem:[%s2061_s7 + $0x8] sm:$0xff]  }
 0x271   : > { %v795_v3 = vmul.f32 %v787_v56, %v1928_v26  ;;  %v1403_v26 = vld [vmem:[%s2061_s7 + $0x10] sm:$0xff]  }
 0x272   : > { %1276 = vmatpush3.bf16.msra.mxu1 %v797_v11  ;;  %v793_v24 = vmul.f32 %v785_v62, %v1933_v31  ;;  %v1406_v31 = vld [vmem:[%s2061_s7 + $0x28] sm:$0xff]  }
 0x273   : > { %1277 = vmatprep.subr.bf16.mxu1 %v1587_v0  ;;  %v799_v25 = vpack.c.bf16 %v795_v3, %v794_v59 }
 0x274   : > { %v798_v27 = vpack.c.bf16 %v793_v24, %v792_v23 }
 0x276   : > { %1278 = vmatpush3.bf16.msra.mxu1 %v798_v27 }
 0x277   : > { %1279 = vmatprep.subr.bf16.mxu1 %v1587_v0 }
 0x27a   : > { %1280 = vmatpush3.bf16.msra.mxu1 %v799_v25 }
 0x27b   : > { %1285 = vmatprep.subr.bf16.mxu1 %v1587_v0 }
 0x27d   : > { %1282 = vmatmul.mubr.msk.bf16.vlgmr.msra.gmra.mrb[0].mxu1 %vm819_vm2, %v1400_v28 }
 0x27e   : > { %1301 = vmatprep.mubr.msk.bf16.mxu1 %vm1588_vm0, %v1587_v0  ;;  %1286 = vmatpush3.bf16.msra.mxu1 %v1401_v16 }
 0x27f   : > { %1287 = vmatprep.subr.bf16.mxu1 %v1587_v0 }
 0x282   : > { %1288 = vmatpush3.bf16.msra.mxu1 %v1402_v21 }
 0x283   : > { %1289 = vmatprep.subr.bf16.mxu1 %v1587_v0 }
 0x286   : > { %1290 = vmatpush3.bf16.msra.mxu1 %v1403_v26 }
 0x287   : > { %1291 = vmatprep.subr.bf16.mxu1 %v1587_v0 }
 0x28a   : > { %1292 = vmatpush3.bf16.msra.mxu1 %v1404_v29 }
 0x28b   : > { %1293 = vmatprep.subr.bf16.mxu1 %v1587_v0 }
 0x28e   : > { %1294 = vmatpush3.bf16.msra.mxu1 %v1405_v30 }
 0x28f   : > { %1295 = vmatprep.subr.bf16.mxu1 %v1587_v0 }
 0x292   : > { %1296 = vmatpush3.bf16.msra.mxu1 %v1406_v31 }
 0x293   : > { %1297 = vmatprep.subr.bf16.mxu1 %v1587_v0 }
 0x296   : > { %1298 = vmatpush3.bf16.msra.mxu1 %v1407_v32 }
 0x297   : > { %1299 = vmatprep.subr.bf16.mxu1 %v1587_v0 }
 0x29a   : > { %1300 = vmatpush3.bf16.msra.mxu1 %v1408_v33 }
 0x350   : > { %v857_v35 = vpop.f32.mrb[0].mxu1 }
 0x351   : > { %v858_v36 = vadd.f32 %v857_v35, %v807_v34  ;;  %v1283_v37 = vpop.f32.mrb[1].mxu1 }
 0x352   : > { %v860_v39 = vpop.f32.mrb[2].mxu1 }
 0x353   : > { %v864_v40 = vmul.f32 %v858_v36, %v858_v36  ;;  %v861_v41 = vadd.f32 %v860_v39, %v812_v38  ;;  %v1284_v42 = vpop.f32.mrb[3].mxu1 }
 0x355   : > { %v866_v43 = vmul.f32 %v864_v40, %v858_v36  ;;  %v865_v44 = vmul.f32 %v861_v41, %v861_v41 }
 0x357   : > { %v868_v45 = vmul.f32 0.044715, %v866_v43  ;;  %v867_v46 = vmul.f32 %v865_v44, %v861_v41 }
 0x359   : > { %v870_v47 = vadd.f32 %v868_v45, %v858_v36  ;;  %v869_v0 = vmul.f32 0.044715, %v867_v46 }
 0x35b   : > { %v872_v48 = vmul.f32 0.7978846, %v870_v47  ;;  %v871_v49 = vadd.f32 %v869_v0, %v861_v41 }
 0x35d   : > { %1429 = vtanh.f32 %v872_v48  ;;  %v873_v50 = vmul.f32 0.7978846, %v871_v49 }
 0x35f   : > { %1431 = vtanh.f32 %v873_v50 }
 0x367   : > { %v1430_v51 = vpop.eup %1429 }
 0x368   : > { %v876_v52 = vadd.f32 1.0, %v1430_v51 }
 0x369   : > { %v1432_v53 = vpop.eup %1431 }
 0x36a   : > { %v878_v54 = vmul.f32 0.5, %v876_v52  ;;  %v877_v55 = vadd.f32 1.0, %v1432_v53 }
 0x36c   : > { %v879_v57 = vmul.f32 0.5, %v877_v55  ;;  %v880_v58 = vmul.f32 %v878_v54, %v858_v36 }
 0x36e   : > { %v881_v60 = vmul.f32 %v879_v57, %v861_v41 }
 0x370   : > { %v882_v61 = vpack.c.bf16 %v881_v60, %v880_v58 }
 0x372   : > { %1302 = vmatmul.mubr.bf16.vlgmr.msra.gmra.mrb[4].mxu1 %v882_v61 }
 0x445   : > { %v983_v1 = vpop.f32.mrb[4].mxu1 }
 0x446   : > { %v1006_v2 = vadd.f32 %v1207_v63, %v983_v1  ;;  %v1303_v4 = vpop.f32.mrb[5].mxu1 }
 0x447   : > { %v986_v5 = vpop.f32.mrb[6].mxu1 }
 0x448   : > { %v1008_v6 = vmul.f32 %v1006_v2, %v1006_v2  ;;  %v1007_v7 = vadd.f32 %v1207_v63, %v986_v5  ;;  %v1304_v8 = vpop.f32.mrb[7].mxu1 }
 0x44a   : > { %v1010_v9 = vmul.f32 %v1008_v6, %v1006_v2  ;;  %v1009_v10 = vmul.f32 %v1007_v7, %v1007_v7 }
 0x44c   : > { %v1012_v11 = vmul.f32 0.044715, %v1010_v9  ;;  %v1011_v12 = vmul.f32 %v1009_v10, %v1007_v7 }
 0x44e   : > { %v1014_v13 = vadd.f32 %v1012_v11, %v1006_v2  ;;  %v1013_v14 = vmul.f32 0.044715, %v1011_v12 }
 0x450   : > { %v1016_v15 = vmul.f32 0.7978846, %v1014_v13  ;;  %v1015_v17 = vadd.f32 %v1013_v14, %v1007_v7 }
 0x452   : > { %1433 = vtanh.f32 %v1016_v15  ;;  %v1017_v18 = vmul.f32 0.7978846, %v1015_v17 }
 0x454   : > { %1435 = vtanh.f32 %v1017_v18 }
 0x45c   : > { %v1434_v19 = vpop.eup %1433 }
 0x45d   : > { %v1020_v20 = vadd.f32 1.0, %v1434_v19 }
 0x45e   : > { %v1436_v22 = vpop.eup %1435 }
 0x45f   : > { %v1022_v56 = vmul.f32 0.5, %v1020_v20  ;;  %v1021_v62 = vadd.f32 1.0, %v1436_v22 }
 0x461   : > { %v1024_v59 = vmul.f32 %v1022_v56, %v1006_v2  ;;  %v1023_v3 = vmul.f32 0.5, %v1021_v62 }
 0x463   : > { %1026 = vst [vmem:[%s411_s9] sm:$0xff] %v1024_v59  ;;  %v1025_v23 = vmul.f32 %v1023_v3, %v1007_v7 }
 0x465   : > { %1027 = vst [vmem:[%s411_s9 + $0x8] sm:$0xff] %v1025_v23 }
 0x466   : > { %1508 = shalt.err (!%p1505_p7)
}
 0x467   : > { %s1509_s22 = scalar_lea.hbm %s2003_s26, 256  ;;  %s1513_s30 = scalar_lea.hbm %s2094_s23, 512 }
 0x468   : > { %p1510_p13 = scmp.ne.s32.totalorder %s2003_s26, %s1509_s22  ;;  %p1514_p12 = scmp.lt.u32.totalorder %s2003_s26, %s2094_s23 }
 0x469   : > { %p1515_p4 = scmp.lt.u32.totalorder %s1513_s30, %s1509_s22  ;;  %p1517_p5 = scmp.lt.u32.totalorder %s1509_s22, %s2003_s26 }
 0x46a   : > { %p1511_p2 = pnand %p1510_p13, %p2095_p10 }
 0x46b   : > { %p1516_p9 = por %p1515_p4, %p1514_p12 }
 0x46c   : > { %p1512_p6 = pneg %p1511_p2 }
 0x46d   : > { %p1518_p11 = por %p1517_p5, %p1516_p9 }
 0x46f   : > { %p1519_p1 = pnand %p1518_p11, %p1512_p6 }
 0x471   : > { %1522 = shalt.err (!%p1519_p1)
}
 0x472   : > { %s1591_s20 = smov 128   ;;  %s1592_s19 = smov 8  }
 0x473   : > { %1311 = dma.vmem_to_hbm [thread:$0]  (%p2095_p10), %s2005_s16, 256, %s2003_s26, %s1029_s18, %s1591_s20, %s1591_s20, %s1592_s19  }
 0x474 PF: > { %s2096_s12 = sld [smem:[#allocation12_spill]]  ;;  %s2097_s25 = sld [smem:[#allocation14_spill]] }
 0x475   : > { %s2098_s17 = sld [smem:[#allocation13_spill]] }
 0x47a   : > { %s1057_s27 = sand.u32 1, %s2096_s12   ;;  %p2099_p0 = scmp.ne.s32.totalorder %s2097_s25, 0 }
 0x47b   : > { %p2100_p8 = scmp.ge.s32.totalorder %s2098_s17, 2  ;;  %s1058_s22 = scalar_lea.sflag [#allocation5], %s1057_s27 }
 0x47d   : > { %p1322_p3 = pnand %p2100_p8, %p2099_p0 }
 0x47f   : > { %1556 = dma.done.wait (!%p1322_p3), %s1058_s22, 256  }
 0x480   : > { %1558 = vsyncadd (!%p1322_p3), %s1058_s22, 4294967040  ;;  %s26_s29 = sadd.s32 1, %s2098_s17   ;;  %s2101_s30 = smov %s1565_s10 }
 0x481   : > { %p23_p7 = scmp.ge.s32.totalorder %s26_s29, 4   ;;  %s2102_s10 = smov %s1569_s11 }
 0x482   : > { %s2103_s11 = smov %s1764_s14  ;;  %s2104_s12 = smov %s1577_s13 }
 0x483   : > { %s2105_s13 = smov %s2108_s28  ;;  %s2106_s14 = smov %s26_s29 }
 0x484   :  { %25 = sbr.rel (!%p23_p7) target bundleno = 9 (0x9), region = 120 }
 0x48b   :  { %1063 = vsyncpa [#allocation4], 1 }
 0x48c   :  { %1065 = vsyncpa [#allocation4 + $0x1], 1 }
 0x48d   :  { %1066 = vsyncpa [#allocation7], 1 }
 0x48e   :  { %1067 = vsyncpa [#allocation5], 1 }
 0x48f   :  { %1069 = vsyncpa [#allocation5 + $0x1], 1 }

// kernel: tpu_custom_call.1
= control target key start
LH: loop header
LB: loop body
LE: loop exit
PB: predicated region body
PF: predicated region fallthrough
CT: control target
= control target key end

     0   :  { %s2054_s0 = inlined_call_operand.hbm [shape: bf16[32,128], index: 0, kind: input, shape index: {}]   ;;  %s2055_s1 = inlined_call_operand.vmem [shape: bf16[128,128], index: 1, kind: input, shape index: {}]   ;;  %s2056_s2 = inlined_call_operand.hbm [shape: f32[1,128], index: 2, kind: input, shape index: {}]   ;;  %s2057_s3 = inlined_call_operand.vmem [shape: bf16[64,16], index: 3, kind: input, shape index: {}]   ;;  %s2058_s4 = inlined_call_operand.vmem [shape: f32[64,1], index: 4, kind: input, shape index: {}]   ;;  %s2059_s5 = inlined_call_operand.vmem [shape: bf16[16,64], index: 5, kind: input, shape index: {}]   ;;  %s2060_s6 = inlined_call_operand.vmem [shape: f32[16,1], index: 6, kind: input, shape index: {}]   ;;  %s2061_s7 = inlined_call_operand.vmem [shape: bf16[128,128], index: 7, kind: input, shape index: {}]   ;;  %s2062_s8 = inlined_call_operand.vmem [shape: f32[1,128], index: 8, kind: input, shape index: {}]   ;;  %s2063_s9 = inlined_call_operand.hbm [shape: f32[32,128], index: 9, kind: output, shape index: {}]  }
   0x1   :  { %2075 = sst [smem:[#allocation15_spill]] %s2063_s9 }
   0x2   :  { %14 = vsyncpa [#allocation4], 0 }
   0x3   :  { %16 = vsyncpa [#allocation4 + $0x1], 0 }
   0x4   :  { %17 = vsyncpa [#allocation7], 0 }
   0x5   :  { %18 = vsyncpa [#allocation5], 0 }
   0x6   :  { %20 = vsyncpa [#allocation5 + $0x1], 0  ;;  %s1643_s30 = smov 0   ;;  %s1645_s10 = smov 0  }
   0x7   :  { %s1647_s11 = smov 0   ;;  %s1649_s12 = smov 0  }
   0x8   :  { %s1651_s13 = smov 0   ;;  %s1653_s14 = smov 0  }
   0x9 LB: > { %2076 = sst [smem:[#allocation12_spill]] %s1561_s30  ;;  %s1165_s15 = sadd.s32 4294967295, %s1581_s14   ;;  %s1581_s14 = sphi %s1653_s14, %s2106_s14   ;;  %s1577_s13 = sphi %s1651_s13, %s2105_s13   ;;  %s1573_s12 = sphi %s1649_s12, %s2104_s12   ;;  %s1569_s11 = sphi %s1647_s11, %s2103_s11   ;;  %s1565_s10 = sphi %s1645_s10, %s2102_s10   ;;  %s1561_s30 = sphi %s1643_s30, %s2101_s30  }
   0xa   : > { %2077 = sst [smem:[#allocation13_spill]] %s1581_s14  ;;  %s1166_s16 = sadd.s32 4294967294, %s1581_s14  }
   0xb   : > { %p52_p0 = scmp.ne.s32.totalorder %s1569_s11, %s1565_s10  ;;  %p53_p1 = scmp.eq.s32.totalorder %s1581_s14, 0 }
   0xc   : > { %p58_p2 = scmp.ne.s32.totalorder %s1565_s10, %s1561_s30  ;;  %p1681_p3 = scmp.eq.s32.totalorder %s1165_s15, 0 }
   0xd   : > { %p265_p4 = scmp.eq.s32.totalorder %s1165_s15, 1  ;;  %p1685_p5 = por %p53_p1, %p52_p0 }
   0xe   : > { %s2078_s18 = scalar_select %p1681_p3, 1, 0 }
   0xf   : > { %p271_p6 = scmp.eq.s32.totalorder %s1166_s16, 1  ;;  %p1691_p7 = por %p1681_p3, %p58_p2 }
  0x10   : > { %p1695_p8 = por %p265_p4, %p52_p0  ;;  %p1167_p10 = scmp.ge.s32.totalorder %s1581_s14, 1 }
  0x11   : > { %s2080_s20 = scalar_select %p1691_p7, 1, 0 }
  0x12   : > { %s2081_s21 = scalar_select %p1695_p8, 1, 0 }
  0x13   : > { %p1699_p9 = por %p271_p6, %p58_p2  ;;  %p278_p11 = scmp.lt.s32.totalorder %s1581_s14, 3 }
  0x14   : > { %s1583_s24 = smov [#allocation6]   ;;  %p1326_p1 = scmp.lt.s32.totalorder %s1581_s14, 2 }
  0x15   : > { %s2082_s22 = scalar_select %p1699_p9, 1, 0 }
  0x16   : > { %p1706_p13 = pnand %p1167_p10, %p278_p11  ;;  %s300_s25 = sshll.u32 %s1583_s24, 4  ;;  %s301_s25 = int_to_ptr.vmem [resolvable:$true] %s300_s25 }
  0x17   : > { %2083 = sst [smem:[#allocation14_spill]] %s2082_s22  ;;  %p1715_p4 = pnand %p1326_p1, %p1685_p5 }
  0x18   : > { %s2084_s23 = scalar_select %p1706_p13, 1, 0 }
  0x19   : > { %p1313_p0 = pneg %p1706_p13  ;;  %s38_s28 = sadd.s32 1, %s1577_s13 }
  0x1a   : > { %s2085_s26 = scalar_select %p1715_p4, 1, 0 }
  0x1b   : > { %p1721_p2 = pnand %p1313_p0, %p1681_p3  ;;  %p1726_p6 = scmp.ge.s32.totalorder %s38_s28, 2 }
  0x1c   : > { %s335_s15 = sand.u32 1, %s1569_s11   ;;  %s1437_s19 = scalar_lea.hbm %s2056_s2, 16 }
  0x1d   : > { %s2087_s29 = scalar_select %p1726_p6, 1, 0 }
  0x1e   : > { %p1438_p5 = scmp.ne.s32.totalorder %s2056_s2, %s1437_s19  ;;  %p1439_p10 = pneg %p1721_p2 }
  0x1f   : > { %p1444_p0 = scmp.lt.u32.totalorder %s1437_s19, %s2056_s2 }
  0x20   : > { %p1440_p11 = pnand %p1439_p10, %p1438_p5 }
  0x22   : > { %p1441_p1 = pneg %p1440_p11 }
  0x24   : > { %p1446_p12 = pnand %p1444_p0, %p1441_p1 }
  0x26   : > { %1449 = shalt.err (!%p1446_p12)
}
  0x27   : > { %s1450_s9 = scalar_lea.vmem %s301_s25, 16  ;;  %s1457_s16 = scalar_lea.vmem %s301_s25, 32 }
  0x28   : > { %p1451_p9 = scmp.ne.s32.totalorder %s301_s25, %s1450_s9  ;;  %p1458_p7 = scmp.lt.s32.totalorder %s301_s25, %s301_s25 }
  0x29   : > { %p1459_p13 = scmp.lt.s32.totalorder %s1457_s16, %s1450_s9 }
  0x2a   : > { %p1453_p8 = pnand %p1451_p9, %p1439_p10 }
  0x2b   : > { %p1460_p4 = por %p1459_p13, %p1458_p7 }
  0x2c   : > { %p1454_p3 = pneg %p1453_p8 }
  0x2e   : > { %p1461_p6 = pnand %p1460_p4, %p1454_p3 }
  0x30   : > { %1464 = shalt.err (!%p1461_p6)
}
  0x31   : > { %1316 = dma.hbm_to_vmem [thread:$0]  (!%p1721_p2), %s2056_s2, 16, %s301_s25, [#allocation7]  }
  0x32   : > { %p2088_p8 = scmp.ne.s32.totalorder %s2087_s29, 0  ;;  %s1172_s9 = sshll.u32 %s335_s15, 3 }
  0x33   : > { %s1213_s22 = sshll.u32 %s1577_s13, 7  ;;  %s339_s16 = scalar_lea.vmem [#allocation3], %s1172_s9 }
  0x34   : > { %s2108_s28 = smov (%p2088_p8, %s38_s28), 0  ;;  %s1759_s19 = scalar_lea.hbm %s2054_s0, %s1213_s22 }
  0x35   : > { %s42_s30 = ssub.s32 %s1577_s13, %s2108_s28  ;;  %s346_s25 = sshll.u32 %s339_s16, 4  ;;  %s1766_s25 = int_to_ptr.vmem [resolvable:$true] %s346_s25 }
  0x36   : > { %p43_p3 = scmp.eq.s32.totalorder %s42_s30, 0  ;;  %s2089_s29 = sadd.s32 1, %s1569_s11 }
  0x37   : > { %s1770_s17 = scalar_lea.sflag [#allocation4], %s335_s15  ;;  %s1465_s30 = scalar_lea.hbm %s1759_s19, 128 }
  0x38   : > { %s1764_s14 = scalar_select %p43_p3, %s1569_s11, %s2089_s29  }
  0x39   : > { %p1466_p7 = scmp.ne.s32.totalorder %s1759_s19, %s1465_s30  ;;  %p2090_p9 = scmp.ne.s32.totalorder %s2085_s26, 0 }
  0x3a   : > { %s1470_s9 = scalar_lea.hbm %s2054_s0, 256  ;;  %p1471_p2 = scmp.lt.u32.totalorder %s1759_s19, %s2054_s0 }
  0x3b   : > { %p1467_p12 = pneg %p2090_p9  ;;  %p1472_p6 = scmp.lt.u32.totalorder %s1470_s9, %s1465_s30 }
  0x3c   : > { %p1474_p10 = scmp.lt.u32.totalorder %s1465_s30, %s1759_s19 }
  0x3d   : > { %p1468_p13 = pnand %p1467_p12, %p1466_p7  ;;  %p1473_p5 = por %p1472_p6, %p1471_p2 }
  0x3f   : > { %p1469_p4 = pneg %p1468_p13  ;;  %p1475_p11 = por %p1474_p10, %p1473_p5 }
  0x41   : > { %p1476_p1 = pnand %p1475_p11, %p1469_p4 }
  0x43   : > { %1479 = shalt.err (!%p1476_p1)
}
  0x44   : > { %s1480_s15 = scalar_lea.vmem %s1766_s25, 128  ;;  %s1584_s29 = smov [#allocation3]  }
  0x45   : > { %p1481_p0 = scmp.ne.s32.totalorder %s1766_s25, %s1480_s15  ;;  %s1485_s22 = sshll.u32 %s1584_s29, 4  ;;  %s1486_s22 = int_to_ptr.vmem [resolvable:$false] %s1485_s22 }
  0x46   : > { %s1487_s27 = scalar_lea.vmem %s1486_s22, 256  ;;  %p1488_p7 = scmp.lt.s32.totalorder %s1766_s25, %s1486_s22 }
  0x47   : > { %p1483_p8 = pnand %p1481_p0, %p1467_p12  ;;  %p1489_p13 = scmp.lt.s32.totalorder %s1487_s27, %s1480_s15 }
  0x49   : > { %p1484_p3 = pneg %p1483_p8  ;;  %p1490_p2 = por %p1489_p13, %p1488_p7 }
  0x4b   : > { %p1491_p6 = pnand %p1490_p2, %p1484_p3 }
  0x4d   : > { %1494 = shalt.err (!%p1491_p6)
}
  0x4e   : > { %s1585_s30 = smov 64   ;;  %s1586_s9 = smov 4  }
  0x4f   : > { %1320 = dma.hbm_to_vmem [thread:$0]  (!%p2090_p9), %s1759_s19, 128, %s1766_s25, %s1770_s17, %s1585_s30, %s1585_s30, %s1586_s9  }
  0x50   : > { %p2091_p12 = scmp.ne.s32.totalorder %s2084_s23, 0 }
  0x51   : > { %s1801_s24 = sand.u32 (!%p2091_p12), 1, %s1565_s10   ;;  %p2092_p4 = scmp.ne.s32.totalorder (!%p2091_p12), %s2080_s20, 0 }
  0x52   : > { %358 = sbr.rel (%p2091_p12) target bundleno = 1140 (0x474), region = 56  ;;  %s1176_s16 = sshll.u32 (!%p2091_p12), %s1801_s24, 3 }
  0x53   : > { %s361_s15 = scalar_lea.sflag (!%p2091_p12), [#allocation4], %s1801_s24  ;;  %s1805_s29 = scalar_lea.vmem (!%p2091_p12), [#allocation3], %s1176_s16 }
  0x59   : > { %1548 = dma.done.wait (%p2092_p4), %s361_s15, 128  }
  0x5a   : > { %1550 = vsyncadd (%p2092_p4), %s361_s15, 4294967168  ;;  %p2093_p9 = scmp.ne.s32.totalorder %s2078_s18, 0 }
  0x5c   : > { %1552 = dma.done.wait (%p2093_p9), [#allocation7], 16  }
  0x5d   : > { %1554 = vsyncadd (%p2093_p9), [#allocation7], 4294967280  ;;  %v1587_v0 = vmov 0.0   ;;  %vm1588_vm0 = vmmov 0   ;;  %v1387_v1 = vld [vmem:[%s2055_s1] sm:$0xff]   ;;  %v1388_v2 = vld [vmem:[%s2055_s1 + $0x8] sm:$0xff]  }
  0x5e   : > { %1243 = vmatprep.subr.bf16.mxu0 %v1587_v0  ;;  %1259 = vmatprep.mubr.msk.bf16.mxu0 %vm1588_vm0, %v1587_v0  ;;  %v1389_v3 = vld [vmem:[%s2055_s1 + $0x10] sm:$0xff]   ;;  %v1390_v4 = vld [vmem:[%s2055_s1 + $0x18] sm:$0xff]   ;;  %v1391_v5 = vld [vmem:[%s2055_s1 + $0x20] sm:$0xff]   ;;  %vm646_vm1 = vcmask 130048   ;;  %v1589_v13 = vmov 0   ;;  %vm819_vm2 = vcmask 523264  }
  0x5f   : > { %1273 = vmatprep.subr.bf16.mxu1 %v1587_v0  ;;  %1281 = vmatprep.mubr.msk.bf16.mxu1 %vm1588_vm0, %v1587_v0  ;;  %v1392_v6 = vld [vmem:[%s2055_s1 + $0x28] sm:$0xff]   ;;  %v1393_v7 = vld [vmem:[%s2055_s1 + $0x30] sm:$0xff]   ;;  %v1394_v8 = vld [vmem:[%s2055_s1 + $0x38] sm:$0xff]   ;;  %s1214_s30 = sshll.u32 %s1573_s12, 8  ;;  %s2094_s23 = sld [smem:[#allocation15_spill]] }
  0x60   : > { %1244 = vmatpush3.bf16.msra.mxu0 %v1387_v1  ;;  %v1395_v9 = vld [vmem:[%s1805_s29] sm:$0xff]   ;;  %v580_v12 = vld [vmem:[%s2058_s4 + $0x10] sm:$0xff]  ;;  %1385 = vset.pattern.permute.xlu0 %v1589_v13  ;;  %v581_v15 = vld [vmem:[%s2058_s4 + $0x18] sm:$0xff]  ;;  %s1178_s29 = sshll.u32 %s1801_s24, 4  ;;  %s1029_s18 = scalar_lea.sflag [#allocation5], %s1801_s24 }
  0x61   : > { %1245 = vmatprep.subr.bf16.mxu0 %v1587_v0  ;;  %v1396_v10 = vld [vmem:[%s2057_s3] sm:$0xff]   ;;  %1386 = vset.pattern.permute.xlu1 %v1589_v13  ;;  %v579_v14 = vld [vmem:[%s2058_s4 + $0x8] sm:$0xff]  ;;  %v584_v18 = vld [vmem:[%s2058_s4 + $0x30] sm:$0xff]  ;;  %s411_s9 = scalar_lea.vmem [#allocation8], %s1178_s29  ;;  %p2095_p10 = scmp.ne.s32.totalorder %s2081_s21, 0 }
  0x62   : > { %v578_v11 = vld [vmem:[%s2058_s4] sm:$0xff]  ;;  %598 = vperm.xlu1 %1386, %v580_v12   ;;  %v583_v17 = vld [vmem:[%s2058_s4 + $0x28] sm:$0xff]  ;;  %v585_v19 = vld [vmem:[%s2058_s4 + $0x38] sm:$0xff]  ;;  %s1042_s16 = sshll.u32 %s411_s9, 4  ;;  %s1590_s12 = smov [#allocation8]   ;;  %s2005_s16 = int_to_ptr.vmem [resolvable:$true] %s1042_s16 }
  0x63   : > { %588 = vperm.xlu0 %1385, %v578_v11   ;;  %v582_v16 = vld [vmem:[%s2058_s4 + $0x20] sm:$0xff]  ;;  %v803_v21 = vld [vmem:[%s2060_s6 + $0x8] sm:$0xff]  ;;  %v1179_v22 = vld [vmem:[#allocation6] ss:$0 sm:$0xff]  ;;  %s1495_s19 = scalar_lea.vmem %s2005_s16, 256  ;;  %s1499_s25 = sshll.u32 %s1590_s12, 4  ;;  %s1500_s25 = int_to_ptr.vmem [resolvable:$false] %s1499_s25 }
  0x64   : > { %1246 = vmatpush3.bf16.msra.mxu0 %v1388_v2  ;;  %v802_v20 = vld [vmem:[%s2060_s6] sm:$0xff]  ;;  %v1397_v48 = vld [vmem:[%s2057_s3 + $0x8] sm:$0xff]   ;;  %v1398_v49 = vld [vmem:[%s2057_s3 + $0x10] sm:$0xff]   ;;  %p1496_p5 = scmp.ne.s32.totalorder %s2005_s16, %s1495_s19  ;;  %s1501_s17 = scalar_lea.vmem %s1500_s25, 512 }
  0x65   : > { %1247 = vmatprep.subr.bf16.mxu0 %v1587_v0  ;;  %v1399_v50 = vld [vmem:[%s2057_s3 + $0x18] sm:$0xff]   ;;  %s2003_s26 = scalar_lea.hbm %s2094_s23, %s1214_s30  ;;  %p1502_p0 = scmp.lt.s32.totalorder %s2005_s16, %s1500_s25 }
  0x66   : > { %603 = vperm.xlu1 %1386, %v581_v15   ;;  %p1497_p11 = pnand %p1496_p5, %p2095_p10  ;;  %p1503_p8 = scmp.lt.s32.totalorder %s1501_s17, %s1495_s19 }
  0x67   : > { %593 = vperm.xlu0 %1385, %v579_v14  }
  0x68   : > { %1248 = vmatpush3.bf16.msra.mxu0 %v1389_v3  ;;  %p1498_p1 = pneg %p1497_p11  ;;  %p1504_p3 = por %p1503_p8, %p1502_p0 }
  0x69   : > { %1249 = vmatprep.subr.bf16.mxu0 %v1587_v0 }
  0x6a   : > { %613 = vperm.xlu1 %1386, %v583_v17   ;;  %p1505_p7 = pnand %p1504_p3, %p1498_p1 }
  0x6b   : > { %608 = vperm.xlu0 %1385, %v582_v16  }
  0x6c   : > { %1250 = vmatpush3.bf16.msra.mxu0 %v1390_v4 }
  0x6d   : > { %1251 = vmatprep.subr.bf16.mxu0 %v1587_v0 }
  0x6e   : > { %623 = vperm.xlu1 %1386, %v585_v19  }
  0x6f   : > { %618 = vperm.xlu0 %1385, %v584_v18  }
  0x70   : > { %1252 = vmatpush3.bf16.msra.mxu0 %v1391_v5 }
  0x71   : > { %1253 = vmatprep.subr.bf16.mxu0 %v1587_v0 }
  0x72   : > { %811 = vperm.xlu1 %1386, %v803_v21  }
  0x73   : > { %806 = vperm.xlu0 %1385, %v802_v20  }
  0x74   : > { %1254 = vmatpush3.bf16.msra.mxu0 %v1392_v6 }
  0x75   : > { %1255 = vmatprep.subr.bf16.mxu0 %v1587_v0 }
  0x78   : > { %1256 = vmatpush3.bf16.msra.mxu0 %v1393_v7 }
  0x79   : > { %1257 = vmatprep.subr.bf16.mxu0 %v1587_v0 }
  0x7c   : > { %1258 = vmatpush3.bf16.msra.mxu0 %v1394_v8 }
  0x7f   : > { %1260 = vmatmul.mubr.bf16.vlgmr.msra.gmra.mrb[0].mxu0 %v1395_v9 }
  0x80   : > { %1265 = vmatprep.mubr.msk.bf16.mxu0 %vm646_vm1, %v1396_v10 }
  0xe1   : > { %v599_v52 = vpop.permute.xlu1 %598 }
  0xe2   : > { %v589_v51 = vpop.permute.xlu0 %588 }
  0xe5   : > { %v604_v54 = vpop.permute.xlu1 %603 }
  0xe6   : > { %v594_v53 = vpop.permute.xlu0 %593 }
  0xe9   : > { %v614_v1 = vpop.permute.xlu1 %613 }
  0xea   : > { %v609_v58 = vpop.permute.xlu0 %608 }
  0xed   : > { %v624_v20 = vpop.permute.xlu1 %623 }
  0xee   : > { %v619_v10 = vpop.permute.xlu0 %618 }
 0x152   : > { %v544_v23 = vpop.f32.mrb[0].mxu0 }
 0x153   : > { %v545_v24 = vadd.f32 %v1179_v22, %v544_v23  ;;  %v1261_v25 = vpop.f32.mrb[1].mxu0 }
 0x154   : > { %v547_v26 = vpop.f32.mrb[2].mxu0 }
 0x155   : > { %v551_v27 = vmul.f32 %v545_v24, %v545_v24  ;;  %v548_v28 = vadd.f32 %v1179_v22, %v547_v26  ;;  %v1262_v29 = vpop.f32.mrb[3].mxu0 }
 0x157   : > { %v553_v30 = vmul.f32 %v551_v27, %v545_v24  ;;  %v552_v31 = vmul.f32 %v548_v28, %v548_v28 }
 0x159   : > { %v555_v32 = vmul.f32 0.044715, %v553_v30  ;;  %v554_v33 = vmul.f32 %v552_v31, %v548_v28 }
 0x15b   : > { %v557_v34 = vadd.f32 %v555_v32, %v545_v24  ;;  %v556_v35 = vmul.f32 0.044715, %v554_v33 }
 0x15d   : > { %v559_v36 = vmul.f32 0.7978846, %v557_v34  ;;  %v558_v37 = vadd.f32 %v556_v35, %v548_v28 }
 0x15f   : > { %1409 = vtanh.f32 %v559_v36  ;;  %v560_v38 = vmul.f32 0.7978846, %v558_v37 }
 0x161   : > { %1411 = vtanh.f32 %v560_v38 }
 0x169   : > { %v1410_v39 = vpop.eup %1409 }
 0x16a   : > { %v563_v40 = vadd.f32 1.0, %v1410_v39 }
 0x16b   : > { %v1412_v41 = vpop.eup %1411 }
 0x16c   : > { %v564_v42 = vadd.f32 1.0, %v1412_v41  ;;  %v565_v43 = vmul.f32 0.5, %v563_v40 }
 0x16e   : > { %v566_v44 = vmul.f32 0.5, %v564_v42  ;;  %v567_v45 = vmul.f32 %v565_v43, %v545_v24 }
 0x170   : > { %v568_v46 = vmul.f32 %v566_v44, %v548_v28 }
 0x172   : > { %v569_v47 = vpack.c.bf16 %v568_v46, %v567_v45 }
 0x174   : > { %1263 = vmatprep.subr.bf16.mxu0 %v569_v47 }
 0x175   : > { %1264 = vmatpush3.bf16.msra.mxu0 %v569_v47 }
 0x178   : > { %1266 = vmatmul.mubr.msk.bf16.vlgmr.msra.gmra.mrb[4].mxu0 %vm646_vm1, %v1397_v48 }
 0x179   : > { %1269 = vmatprep.mubr.msk.bf16.mxu0 %vm646_vm1, %v1398_v49 }
 0x180   : > { %1270 = vmatmul.mubr.msk.bf16.gmra.mrb[8].mxu0 %vm646_vm1, %v1399_v50 }
 0x24b   : > { %v1267_v55 = vpop.f32.mrb[4].mxu0 }
 0x24c   : > { %v1899_v56 = vadd.f32 %v1267_v55, %v599_v52  ;;  %v693_v57 = vpop.f32.mrb[5].mxu0 }
 0x24d   : > { %v1901_v59 = vadd.f32 %v693_v57, %v589_v51  ;;  %v1268_v60 = vpop.f32.mrb[6].mxu0 }
 0x24e   : > { %v726_v61 = vmul.f32 %v1899_v56, %v1899_v56  ;;  %v1905_v62 = vadd.f32 %v1268_v60, %v604_v54  ;;  %v696_v63 = vpop.f32.mrb[7].mxu0 }
 0x24f   : > { %v724_v2 = vmul.f32 %v1901_v59, %v1901_v59  ;;  %v1909_v3 = vadd.f32 %v696_v63, %v594_v53 }
 0x250   : > { %v734_v4 = vmul.f32 %v726_v61, %v1899_v56  ;;  %v727_v5 = vmul.f32 %v1905_v62, %v1905_v62 }
 0x251   : > { %v732_v6 = vmul.f32 %v724_v2, %v1901_v59  ;;  %v725_v7 = vmul.f32 %v1909_v3, %v1909_v3 }
 0x252   : > { %v742_v8 = vmul.f32 0.044715, %v734_v4  ;;  %v735_v9 = vmul.f32 %v727_v5, %v1905_v62 }
 0x253   : > { %v740_v11 = vmul.f32 0.044715, %v732_v6  ;;  %v733_v12 = vmul.f32 %v725_v7, %v1909_v3  ;;  %v1271_v13 = vpop.f32.mrb[8].mxu0 }
 0x254   : > { %v750_v14 = vadd.f32 %v742_v8, %v1899_v56  ;;  %v743_v15 = vmul.f32 0.044715, %v735_v9  ;;  %v1920_v16 = vadd.f32 %v1271_v13, %v619_v10  ;;  %v709_v17 = vpop.f32.mrb[9].mxu0 }
 0x255   : > { %v748_v18 = vadd.f32 %v740_v11, %v1901_v59  ;;  %v741_v19 = vmul.f32 0.044715, %v733_v12  ;;  %v1923_v21 = vadd.f32 %v709_v17, %v609_v58  ;;  %v1272_v22 = vpop.f32.mrb[10].mxu0 }
 0x256   : > { %v758_v23 = vmul.f32 0.7978846, %v750_v14  ;;  %v751_v24 = vadd.f32 %v743_v15, %v1905_v62  ;;  %v730_v25 = vmul.f32 %v1920_v16, %v1920_v16  ;;  %v1928_v26 = vadd.f32 %v1272_v22, %v624_v20  ;;  %v712_v27 = vpop.f32.mrb[11].mxu0 }
 0x257   : > { %v756_v28 = vmul.f32 0.7978846, %v748_v18  ;;  %v749_v29 = vadd.f32 %v741_v19, %v1909_v3  ;;  %v728_v30 = vmul.f32 %v1923_v21, %v1923_v21  ;;  %v1933_v31 = vadd.f32 %v712_v27, %v614_v1 }
 0x258   : > { %1413 = vtanh.f32 %v758_v23  ;;  %v759_v32 = vmul.f32 0.7978846, %v751_v24  ;;  %v738_v33 = vmul.f32 %v730_v25, %v1920_v16  ;;  %v731_v34 = vmul.f32 %v1928_v26, %v1928_v26 }
 0x259   : > { %v757_v35 = vmul.f32 0.7978846, %v749_v29  ;;  %v736_v36 = vmul.f32 %v728_v30, %v1923_v21  ;;  %v729_v37 = vmul.f32 %v1933_v31, %v1933_v31  ;;  %1415 = vtanh.f32 %v756_v28  ;;  %v1400_v28 = vld [vmem:[%s2059_s5] sm:$0xff]   ;;  %v1404_v29 = vld [vmem:[%s2061_s7 + $0x18] sm:$0xff]  }
 0x25a   : > { %1417 = vtanh.f32 %v759_v32  ;;  %v746_v38 = vmul.f32 0.044715, %v738_v33  ;;  %v739_v39 = vmul.f32 %v731_v34, %v1928_v26  ;;  %v1405_v30 = vld [vmem:[%s2061_s7 + $0x20] sm:$0xff]   ;;  %v1407_v32 = vld [vmem:[%s2061_s7 + $0x30] sm:$0xff]   ;;  %v1408_v33 = vld [vmem:[%s2061_s7 + $0x38] sm:$0xff]   ;;  %v807_v34 = vpop.permute.xlu0 %806 }
 0x25b   : > { %v744_v40 = vmul.f32 0.044715, %v736_v36  ;;  %v737_v41 = vmul.f32 %v729_v37, %v1933_v31  ;;  %1419 = vtanh.f32 %v757_v35 }
 0x25c   : > { %v754_v42 = vadd.f32 %v746_v38, %v1920_v16  ;;  %v747_v43 = vmul.f32 0.044715, %v739_v39  ;;  %v812_v38 = vpop.permute.xlu1 %811 }
 0x25d   : > { %v752_v44 = vadd.f32 %v744_v40, %v1923_v21  ;;  %v745_v45 = vmul.f32 0.044715, %v737_v41 }
 0x25e   : > { %v762_v46 = vmul.f32 0.7978846, %v754_v42  ;;  %v755_v47 = vadd.f32 %v747_v43, %v1928_v26 }
 0x25f   : > { %v760_v48 = vmul.f32 0.7978846, %v752_v44  ;;  %v753_v49 = vadd.f32 %v745_v45, %v1933_v31 }
 0x260   : > { %1421 = vtanh.f32 %v762_v46  ;;  %v763_v50 = vmul.f32 0.7978846, %v755_v47 }
 0x261   : > { %1423 = vtanh.f32 %v760_v48  ;;  %v761_v51 = vmul.f32 0.7978846, %v753_v49 }
 0x262   : > { %v1414_v52 = vpop.eup %1413  ;;  %1425 = vtanh.f32 %v763_v50 }
 0x263   : > { %v1416_v53 = vpop.eup %1415  ;;  %1427 = vtanh.f32 %v761_v51  ;;  %v774_v54 = vadd.f32 1.0, %v1414_v52 }
 0x264   : > { %v1418_v55 = vpop.eup %1417  ;;  %v772_v57 = vadd.f32 1.0, %v1416_v53 }
 0x265   : > { %v1420_v58 = vpop.eup %1419  ;;  %v775_v60 = vadd.f32 1.0, %v1418_v55  ;;  %v782_v61 = vmul.f32 0.5, %v774_v54 }
 0x266   : > { %v773_v63 = vadd.f32 1.0, %v1420_v58  ;;  %v780_v1 = vmul.f32 0.5, %v772_v57 }
 0x267   : > { %v783_v2 = vmul.f32 0.5, %v775_v60  ;;  %v790_v5 = vmul.f32 %v782_v61, %v1899_v56 }
 0x268   : > { %v781_v4 = vmul.f32 0.5, %v773_v63  ;;  %v788_v8 = vmul.f32 %v780_v1, %v1901_v59  ;;  %v1207_v63 = vld [vmem:[%s2062_s8] ss:$0 sm:$0xff] }
 0x269   : > { %v791_v6 = vmul.f32 %v783_v2, %v1905_v62 }
 0x26a   : > { %v1422_v7 = vpop.eup %1421  ;;  %v789_v9 = vmul.f32 %v781_v4, %v1909_v3 }
 0x26b   : > { %v1424_v10 = vpop.eup %1423  ;;  %v797_v11 = vpack.c.bf16 %v791_v6, %v790_v5  ;;  %v778_v12 = vadd.f32 1.0, %v1422_v7 }
 0x26c   : > { %v1426_v13 = vpop.eup %1425  ;;  %v796_v14 = vpack.c.bf16 %v789_v9, %v788_v8  ;;  %v776_v15 = vadd.f32 1.0, %v1424_v10 }
 0x26d   : > { %v1428_v17 = vpop.eup %1427  ;;  %v779_v18 = vadd.f32 1.0, %v1426_v13  ;;  %v786_v19 = vmul.f32 0.5, %v778_v12 }
 0x26e   : > { %1274 = vmatpush3.bf16.msra.mxu1 %v796_v14  ;;  %v777_v20 = vadd.f32 1.0, %v1428_v17  ;;  %v784_v22 = vmul.f32 0.5, %v776_v15 }
 0x26f   : > { %1275 = vmatprep.subr.bf16.mxu1 %v1587_v0  ;;  %v787_v56 = vmul.f32 0.5, %v779_v18  ;;  %v794_v59 = vmul.f32 %v786_v19, %v1920_v16  ;;  %v1401_v16 = vld [vmem:[%s2061_s7] sm:$0xff]  }
 0x270   : > { %v785_v62 = vmul.f32 0.5, %v777_v20  ;;  %v792_v23 = vmul.f32 %v784_v22, %v1923_v21  ;;  %v1402_v21 = vld [vmem:[%s2061_s7 + $0x8] sm:$0xff]  }
 0x271   : > { %v795_v3 = vmul.f32 %v787_v56, %v1928_v26  ;;  %v1403_v26 = vld [vmem:[%s2061_s7 + $0x10] sm:$0xff]  }
 0x272   : > { %1276 = vmatpush3.bf16.msra.mxu1 %v797_v11  ;;  %v793_v24 = vmul.f32 %v785_v62, %v1933_v31  ;;  %v1406_v31 = vld [vmem:[%s2061_s7 + $0x28] sm:$0xff]  }
 0x273   : > { %1277 = vmatprep.subr.bf16.mxu1 %v1587_v0  ;;  %v799_v25 = vpack.c.bf16 %v795_v3, %v794_v59 }
 0x274   : > { %v798_v27 = vpack.c.bf16 %v793_v24, %v792_v23 }
 0x276   : > { %1278 = vmatpush3.bf16.msra.mxu1 %v798_v27 }
 0x277   : > { %1279 = vmatprep.subr.bf16.mxu1 %v1587_v0 }
 0x27a   : > { %1280 = vmatpush3.bf16.msra.mxu1 %v799_v25 }
 0x27b   : > { %1285 = vmatprep.subr.bf16.mxu1 %v1587_v0 }
 0x27d   : > { %1282 = vmatmul.mubr.msk.bf16.vlgmr.msra.gmra.mrb[0].mxu1 %vm819_vm2, %v1400_v28 }
 0x27e   : > { %1301 = vmatprep.mubr.msk.bf16.mxu1 %vm1588_vm0, %v1587_v0  ;;  %1286 = vmatpush3.bf16.msra.mxu1 %v1401_v16 }
 0x27f   : > { %1287 = vmatprep.subr.bf16.mxu1 %v1587_v0 }
 0x282   : > { %1288 = vmatpush3.bf16.msra.mxu1 %v1402_v21 }
 0x283   : > { %1289 = vmatprep.subr.bf16.mxu1 %v1587_v0 }
 0x286   : > { %1290 = vmatpush3.bf16.msra.mxu1 %v1403_v26 }
 0x287   : > { %1291 = vmatprep.subr.bf16.mxu1 %v1587_v0 }
 0x28a   : > { %1292 = vmatpush3.bf16.msra.mxu1 %v1404_v29 }
 0x28b   : > { %1293 = vmatprep.subr.bf16.mxu1 %v1587_v0 }
 0x28e   : > { %1294 = vmatpush3.bf16.msra.mxu1 %v1405_v30 }
 0x28f   : > { %1295 = vmatprep.subr.bf16.mxu1 %v1587_v0 }
 0x292   : > { %1296 = vmatpush3.bf16.msra.mxu1 %v1406_v31 }
 0x293   : > { %1297 = vmatprep.subr.bf16.mxu1 %v1587_v0 }
 0x296   : > { %1298 = vmatpush3.bf16.msra.mxu1 %v1407_v32 }
 0x297   : > { %1299 = vmatprep.subr.bf16.mxu1 %v1587_v0 }
 0x29a   : > { %1300 = vmatpush3.bf16.msra.mxu1 %v1408_v33 }
 0x350   : > { %v857_v35 = vpop.f32.mrb[0].mxu1 }
 0x351   : > { %v858_v36 = vadd.f32 %v857_v35, %v807_v34  ;;  %v1283_v37 = vpop.f32.mrb[1].mxu1 }
 0x352   : > { %v860_v39 = vpop.f32.mrb[2].mxu1 }
 0x353   : > { %v864_v40 = vmul.f32 %v858_v36, %v858_v36  ;;  %v861_v41 = vadd.f32 %v860_v39, %v812_v38  ;;  %v1284_v42 = vpop.f32.mrb[3].mxu1 }
 0x355   : > { %v866_v43 = vmul.f32 %v864_v40, %v858_v36  ;;  %v865_v44 = vmul.f32 %v861_v41, %v861_v41 }
 0x357   : > { %v868_v45 = vmul.f32 0.044715, %v866_v43  ;;  %v867_v46 = vmul.f32 %v865_v44, %v861_v41 }
 0x359   : > { %v870_v47 = vadd.f32 %v868_v45, %v858_v36  ;;  %v869_v0 = vmul.f32 0.044715, %v867_v46 }
 0x35b   : > { %v872_v48 = vmul.f32 0.7978846, %v870_v47  ;;  %v871_v49 = vadd.f32 %v869_v0, %v861_v41 }
 0x35d   : > { %1429 = vtanh.f32 %v872_v48  ;;  %v873_v50 = vmul.f32 0.7978846, %v871_v49 }
 0x35f   : > { %1431 = vtanh.f32 %v873_v50 }
 0x367   : > { %v1430_v51 = vpop.eup %1429 }
 0x368   : > { %v876_v52 = vadd.f32 1.0, %v1430_v51 }
 0x369   : > { %v1432_v53 = vpop.eup %1431 }
 0x36a   : > { %v878_v54 = vmul.f32 0.5, %v876_v52  ;;  %v877_v55 = vadd.f32 1.0, %v1432_v53 }
 0x36c   : > { %v879_v57 = vmul.f32 0.5, %v877_v55  ;;  %v880_v58 = vmul.f32 %v878_v54, %v858_v36 }
 0x36e   : > { %v881_v60 = vmul.f32 %v879_v57, %v861_v41 }
 0x370   : > { %v882_v61 = vpack.c.bf16 %v881_v60, %v880_v58 }
 0x372   : > { %1302 = vmatmul.mubr.bf16.vlgmr.msra.gmra.mrb[4].mxu1 %v882_v61 }
 0x445   : > { %v983_v1 = vpop.f32.mrb[4].mxu1 }
 0x446   : > { %v1006_v2 = vadd.f32 %v1207_v63, %v983_v1  ;;  %v1303_v4 = vpop.f32.mrb[5].mxu1 }
 0x447   : > { %v986_v5 = vpop.f32.mrb[6].mxu1 }
 0x448   : > { %v1008_v6 = vmul.f32 %v1006_v2, %v1006_v2  ;;  %v1007_v7 = vadd.f32 %v1207_v63, %v986_v5  ;;  %v1304_v8 = vpop.f32.mrb[7].mxu1 }
 0x44a   : > { %v1010_v9 = vmul.f32 %v1008_v6, %v1006_v2  ;;  %v1009_v10 = vmul.f32 %v1007_v7, %v1007_v7 }
 0x44c   : > { %v1012_v11 = vmul.f32 0.044715, %v1010_v9  ;;  %v1011_v12 = vmul.f32 %v1009_v10, %v1007_v7 }
 0x44e   : > { %v1014_v13 = vadd.f32 %v1012_v11, %v1006_v2  ;;  %v1013_v14 = vmul.f32 0.044715, %v1011_v12 }
 0x450   : > { %v1016_v15 = vmul.f32 0.7978846, %v1014_v13  ;;  %v1015_v17 = vadd.f32 %v1013_v14, %v1007_v7 }
 0x452   : > { %1433 = vtanh.f32 %v1016_v15  ;;  %v1017_v18 = vmul.f32 0.7978846, %v1015_v17 }
 0x454   : > { %1435 = vtanh.f32 %v1017_v18 }
 0x45c   : > { %v1434_v19 = vpop.eup %1433 }
 0x45d   : > { %v1020_v20 = vadd.f32 1.0, %v1434_v19 }
 0x45e   : > { %v1436_v22 = vpop.eup %1435 }
 0x45f   : > { %v1022_v56 = vmul.f32 0.5, %v1020_v20  ;;  %v1021_v62 = vadd.f32 1.0, %v1436_v22 }
 0x461   : > { %v1024_v59 = vmul.f32 %v1022_v56, %v1006_v2  ;;  %v1023_v3 = vmul.f32 0.5, %v1021_v62 }
 0x463   : > { %1026 = vst [vmem:[%s411_s9] sm:$0xff] %v1024_v59  ;;  %v1025_v23 = vmul.f32 %v1023_v3, %v1007_v7 }
 0x465   : > { %1027 = vst [vmem:[%s411_s9 + $0x8] sm:$0xff] %v1025_v23 }
 0x466   : > { %1508 = shalt.err (!%p1505_p7)
}
 0x467   : > { %s1509_s22 = scalar_lea.hbm %s2003_s26, 256  ;;  %s1513_s30 = scalar_lea.hbm %s2094_s23, 512 }
 0x468   : > { %p1510_p13 = scmp.ne.s32.totalorder %s2003_s26, %s1509_s22  ;;  %p1514_p12 = scmp.lt.u32.totalorder %s2003_s26, %s2094_s23 }
 0x469   : > { %p1515_p4 = scmp.lt.u32.totalorder %s1513_s30, %s1509_s22  ;;  %p1517_p5 = scmp.lt.u32.totalorder %s1509_s22, %s2003_s26 }
 0x46a   : > { %p1511_p2 = pnand %p1510_p13, %p2095_p10 }
 0x46b   : > { %p1516_p9 = por %p1515_p4, %p1514_p12 }
 0x46c   : > { %p1512_p6 = pneg %p1511_p2 }
 0x46d   : > { %p1518_p11 = por %p1517_p5, %p1516_p9 }
 0x46f   : > { %p1519_p1 = pnand %p1518_p11, %p1512_p6 }
 0x471   : > { %1522 = shalt.err (!%p1519_p1)
}
 0x472   : > { %s1591_s20 = smov 128   ;;  %s1592_s19 = smov 8  }
 0x473   : > { %1311 = dma.vmem_to_hbm [thread:$0]  (%p2095_p10), %s2005_s16, 256, %s2003_s26, %s1029_s18, %s1591_s20, %s1591_s20, %s1592_s19  }
 0x474 PF: > { %s2096_s12 = sld [smem:[#allocation12_spill]]  ;;  %s2097_s25 = sld [smem:[#allocation14_spill]] }
 0x475   : > { %s2098_s17 = sld [smem:[#allocation13_spill]] }
 0x47a   : > { %s1057_s27 = sand.u32 1, %s2096_s12   ;;  %p2099_p0 = scmp.ne.s32.totalorder %s2097_s25, 0 }
 0x47b   : > { %p2100_p8 = scmp.ge.s32.totalorder %s2098_s17, 2  ;;  %s1058_s22 = scalar_lea.sflag [#allocation5], %s1057_s27 }
 0x47d   : > { %p1322_p3 = pnand %p2100_p8, %p2099_p0 }
 0x47f   : > { %1556 = dma.done.wait (!%p1322_p3), %s1058_s22, 256  }
 0x480   : > { %1558 = vsyncadd (!%p1322_p3), %s1058_s22, 4294967040  ;;  %s26_s29 = sadd.s32 1, %s2098_s17   ;;  %s2101_s30 = smov %s1565_s10 }
 0x481   : > { %p23_p7 = scmp.ge.s32.totalorder %s26_s29, 4   ;;  %s2102_s10 = smov %s1569_s11 }
 0x482   : > { %s2103_s11 = smov %s1764_s14  ;;  %s2104_s12 = smov %s1577_s13 }
 0x483   : > { %s2105_s13 = smov %s2108_s28  ;;  %s2106_s14 = smov %s26_s29 }
 0x484   :  { %25 = sbr.rel (!%p23_p7) target bundleno = 9 (0x9), region = 120 }
 0x48b   :  { %1063 = vsyncpa [#allocation4], 1 }
 0x48c   :  { %1065 = vsyncpa [#allocation4 + $0x1], 1 }
 0x48d   :  { %1066 = vsyncpa [#allocation7], 1 }
 0x48e   :  { %1067 = vsyncpa [#allocation5], 1 }
 0x48f   :  { %1069 = vsyncpa [#allocation5 + $0x1], 1 }

</bundles_post_ra>
